<compile_context>
chip_gen: v6e
topology: v6e:2x2x1
jax: 0.10.0
libtpu: 0.0.40
codegen_flags: <defaults>
</compile_context>

<pallas_src>
import functools

import jax
import jax.numpy as jnp
from jax.experimental import pallas as pl
from jax.experimental.pallas import tpu as pltpu

MAX_OUT_CHUNKS = 8          # max parallel partial-sum chunks per batch element
_CHUNK = 8 * 128            # one dense (8, 128) vreg tile of anchors


def _vmem_limit_bytes():
    try:
        cap = pltpu.get_tpu_info().vmem_capacity_bytes
    except Exception:
        cap = 128 * 1024 * 1024
    # 32 MiB scoped limit is safe on every generation (v7x physical VMEM is 64 MiB).
    return int(min(32 * 1024 * 1024, cap // 2))


def _pick_tiles(r8, c, n_batch, budget_bytes):
    """Pick (trc, n_out, n_in): rows-of-8 chunks per grid step and the grid split."""
    per_chunk = (c + 8) * _CHUNK * 4                 # cls (C) + reg (4) + anchors (4), f32
    cap = max(1, budget_bytes // (2 * per_chunk))    # pipeline double-buffers inputs
    cap = min(cap, r8)
    if n_batch == 1 and r8 >= 2:
        cap = min(cap, max(1, r8 // 2))              # >= 2 parallel grid units for v7x
    trc = cap
    while r8 % trc:                                  # largest divisor of r8 <= cap
        trc -= 1
    n_tiles = r8 // trc
    n_out = 1
    for d in range(min(MAX_OUT_CHUNKS, n_tiles), 0, -1):
        if n_tiles % d == 0:
            n_out = d
            break
    return trc, n_out, n_tiles // n_out


# -----------------------------------------------------------------------------
# Fused kernel: IoU/argmax + label & box gather + focal + smooth-L1 + num_pos
# -----------------------------------------------------------------------------
def _fused_kernel(nb_ref, boxes_ref, labels_ref, cls_ref, reg_ref, anch_ref,
                  cls_out_ref, reg_out_ref, npos_out_ref,
                  acc_cls, acc_reg, acc_np,
                  *, m_pad, num_x, num_classes, trc, alpha, gamma, divide_line):
    b = pl.program_id(0)
    o = pl.program_id(1)
    i_in = pl.program_id(2)
    n_in = pl.num_programs(2)

    @pl.when(i_in == 0)
    def _():
        acc_cls[...] = jnp.zeros_like(acc_cls)
        acc_reg[...] = jnp.zeros_like(acc_reg)
        acc_np[...] = jnp.zeros_like(acc_np)

    nb = nb_ref[b]
    chunk0 = (o * n_in + i_in) * trc

    sub_iota = jax.lax.broadcasted_iota(jnp.int32, (8, 128), 0)
    lane_iota = jax.lax.broadcasted_iota(jnp.int32, (8, 128), 1)
    cls_iota = jax.lax.broadcasted_iota(jnp.int32, (num_classes, 8, 128), 0)
    dl = divide_line

    @pl.loop(0, trc)
    def _(rc):
        anch_c = anch_ref[rc]                         # (4, 8, 128)
        ax1, ay1, ax2, ay2 = anch_c[0], anch_c[1], anch_c[2], anch_c[3]
        area_a = (ax2 - ax1) * (ay2 - ay1)

        # ---- IoU + first-argmax over GT boxes, carrying matched label & box ----
        def box_step(j, carry, *, masked):
            bi, bl, g1, g2, g3, g4 = carry
            base = (b * m_pad + j) * 4
            bx1 = boxes_ref[base + 0]
            by1 = boxes_ref[base + 1]
            bx2 = boxes_ref[base + 2]
            by2 = boxes_ref[base + 3]
            lab_j = labels_ref[b * m_pad + j]
            iw = jnp.maximum(jnp.minimum(ax2, bx2) - jnp.maximum(ax1, bx1), 0.0)
            ih = jnp.maximum(jnp.minimum(ay2, by2) - jnp.maximum(ay1, by1), 0.0)
            inter = iw * ih
            union = area_a + (bx2 - bx1) * (by2 - by1) - inter
            iou_j = inter / union            # exact divide: 0.4 / 0.5 thresholds
            better = iou_j > bi              # strict '>' keeps first argmax on ties;
            if masked:                       # NaN IoU (degenerate box) is skipped.
                better = better & (j < nb)
            return (jnp.where(better, iou_j, bi),
                    jnp.where(better, lab_j, bl),
                    jnp.where(better, bx1, g1),
                    jnp.where(better, by1, g2),
                    jnp.where(better, bx2, g3),
                    jnp.where(better, by2, g4))

        carry = (jnp.full((8, 128), -1.0, jnp.float32),
                 jnp.zeros((8, 128), jnp.int32),
                 ax1, ay1, ax2, ay2)
        if m_pad <= 32:                      # common case: fully unrolled static loop
            for j in range(m_pad):
                carry = box_step(j, carry, masked=True)
        else:                                # many GT boxes: dynamic trip count
            carry = jax.lax.fori_loop(
                0, nb, functools.partial(box_step, masked=False), carry)
        best_iou, best_lab, gx1, gy1, gx2, gy2 = carry

        anchor_idx = (chunk0 + rc) * _CHUNK + sub_iota * 128 + lane_iota
        anchor_valid = anchor_idx < num_x    # exact masking of the padded tail

        # ---- labels + focal loss (single-log / single-pow form) ----------------
        # Reference semantics: labels = -1; matched class of positives (iou>=0.5)
        # = 1; all classes of anchors with iou < 0.4 = 0 (disjoint from positives);
        # nb == 0 keeps iou == -1 -> all-zero labels.
        positive = best_iou >= 0.5
        zero_row = best_iou < 0.4
        is_pos_cls = positive[None] & (cls_iota == best_lab[None])     # (C, 8, 128)
        valid = (zero_row[None] | is_pos_cls) & anchor_valid[None]

        p = jnp.clip(cls_ref[rc], 1e-6, 1.0 - 1e-6)                    # (C, 8, 128)
        pt = jnp.where(is_pos_cls, p, 1.0 - p)
        w = jnp.where(is_pos_cls, alpha, 1.0 - alpha)
        focal = jnp.where(valid, w * (1.0 - pt) ** gamma * (-jnp.log(pt)), 0.0)
        acc_cls[...] += jnp.sum(focal, axis=0)        # class-axis reduce = VPU adds

        # ---- box encoding + smooth L1 over positive anchors --------------------
        mask = positive & anchor_valid
        maskf = mask.astype(jnp.float32)
        wa = ax2 - ax1
        ha = ay2 - ay1
        xa = ax1 + 0.5 * wa
        ya = ay1 + 0.5 * ha
        # mask-before-log/divide: masked-out lanes stay finite and are zeroed below
        wa_s = jnp.where(mask, wa, 1.0)
        ha_s = jnp.where(mask, ha, 1.0)
        wg = jnp.where(mask, gx2 - gx1, 1.0)
        hg = jnp.where(mask, gy2 - gy1, 1.0)
        xg = jnp.where(mask, gx1 + 0.5 * (gx2 - gx1), xa)
        yg = jnp.where(mask, gy1 + 0.5 * (gy2 - gy1), ya)
        inv_wa = 1.0 / wa_s                  # 2 divides reused for tx/tw and ty/th
        inv_ha = 1.0 / ha_s
        # TODO(synk): encode_boxes source was not provided; standard (dx, dy, dw, dh)
        # anchor-relative encoding is used here.
        tx = (xg - xa) * inv_wa
        ty = (yg - ya) * inv_ha
        tw = jnp.log(wg * inv_wa)
        th = jnp.log(hg * inv_ha)

        reg_c = reg_ref[rc]                  # (4, 8, 128)

        def sl1(d):
            d = jnp.abs(d)
            return jnp.where(d < dl, (0.5 / dl) * d * d, d - 0.5 * dl)

        acc_reg[...] += (sl1(reg_c[0] - tx) + sl1(reg_c[1] - ty) +
                         sl1(reg_c[2] - tw) + sl1(reg_c[3] - th)) * maskf
        acc_np[...] += maskf

    @pl.when(i_in == pl.num_programs(2) - 1)
    def _():
        cls_out_ref[...] = acc_cls[...]
        reg_out_ref[...] = acc_reg[...]
        npos_out_ref[...] = acc_np[...]


def _fused_focal_loss_call(nb_arr, boxes_flat, labels_flat, cls_f, reg_f, anc_f,
                           *, num_x, m_pad, alpha, gamma, divide_line):
    n, r8, c, _, _ = cls_f.shape
    vmem_limit = _vmem_limit_bytes()
    trc, n_out, n_in = _pick_tiles(r8, c, n, vmem_limit // 4)

    smem = pl.BlockSpec(memory_space=pltpu.MemorySpace.SMEM)
    tile_map = lambda b, o, i: (b, o * n_in + i, 0, 0, 0)
    anch_map = lambda b, o, i: (o * n_in + i, 0, 0, 0)
    out_map = lambda b, o, i: (b, o, 0, 0)

    kernel = functools.partial(
        _fused_kernel, m_pad=m_pad, num_x=num_x, num_classes=c, trc=trc,
        alpha=alpha, gamma=gamma, divide_line=divide_line)

    out_shape = tuple(jax.ShapeDtypeStruct((n, n_out, 8, 128), jnp.float32)
                      for _ in range(3))
    out_specs = [pl.BlockSpec((None, None, 8, 128), out_map) for _ in range(3)]

    return pl.pallas_call(
        kernel,
        out_shape=out_shape,
        grid_spec=pltpu.PrefetchScalarGridSpec(
            num_scalar_prefetch=0,
            grid=(n, n_out, n_in),
            in_specs=[smem, smem, smem,
                      pl.BlockSpec((None, trc, c, 8, 128), tile_map),
                      pl.BlockSpec((None, trc, 4, 8, 128), tile_map),
                      pl.BlockSpec((trc, 4, 8, 128), anch_map)],
            out_specs=out_specs,
            scratch_shapes=[pltpu.VMEM((8, 128), jnp.float32)] * 3),
        compiler_params=pltpu.CompilerParams(
            dimension_semantics=("parallel", "parallel", "arbitrary"),
            vmem_limit_bytes=vmem_limit),
    )(nb_arr, boxes_flat, labels_flat, cls_f, reg_f, anc_f)


# -----------------------------------------------------------------------------
# FocalLoss module (wrapper / glue)
# -----------------------------------------------------------------------------
class FocalLoss:
    def __init__(self, alpha=0.25, gamma=2, divide_line=1.0 / 9):
        self.alpha = float(alpha)
        g = float(gamma)
        self.gamma = int(g) if g.is_integer() else g
        self.divide_line = float(divide_line)

    def __call__(self, classifications, regressions, anchors, targets):
        """classifications [N, NUM_X, C], regressions [N, NUM_X, 4], anchors [NUM_X, 4],
        targets: list of {'labels': [Mi] int, 'boxes': [Mi, 4]} (boxes = l, t, r, b)."""
        n, num_x, c = classifications.shape

        # --- pad the anchor axis to a multiple of 1024 (8 sublanes x 128 lanes) ---
        num_x_pad = -(-num_x // _CHUNK) * _CHUNK
        pad = num_x_pad - num_x
        r8 = num_x_pad // _CHUNK

        cls = jnp.asarray(classifications, jnp.float32)
        reg = jnp.asarray(regressions, jnp.float32)
        anc = jnp.asarray(anchors, jnp.float32)
        if pad:
            cls = jnp.pad(cls, ((0, 0), (0, pad), (0, 0)))
            reg = jnp.pad(reg, ((0, 0), (0, pad), (0, 0)))
            anc = jnp.pad(anc, ((0, pad), (0, 0)))

        # TODO(synk): this relayout is one extra HBM pass over cls/reg; consuming the
        # native [N, NUM_X, C] layout in-kernel (classes on lanes) would remove it.
        cls_f = cls.reshape(n, r8, 8, 128, c).transpose(0, 1, 4, 2, 3)   # (N, R8, C, 8, 128)
        reg_f = reg.reshape(n, r8, 8, 128, 4).transpose(0, 1, 4, 2, 3)   # (N, R8, 4, 8, 128)
        anc_f = anc.reshape(r8, 8, 128, 4).transpose(0, 3, 1, 2)         # (R8, 4, 8, 128)

        # --- GT boxes / labels: pad to one fixed M_PAD, flatten into SMEM tables ---
        m_list = [int(t['labels'].shape[0]) for t in targets]
        m_pad = max(8, pl.next_power_of_2(max(max(m_list), 1)))
        boxes_pad, labels_pad = [], []
        for t, m in zip(targets, m_list):
            if m > 0:
                boxes_pad.append(jnp.pad(jnp.asarray(t['boxes'], jnp.float32),
                                         ((0, m_pad - m), (0, 0))))
                labels_pad.append(jnp.pad(jnp.asarray(t['labels'], jnp.int32),
                                          (0, m_pad - m)))
            else:
                boxes_pad.append(jnp.zeros((m_pad, 4), jnp.float32))
                labels_pad.append(jnp.zeros((m_pad,), jnp.int32))
        boxes_flat = jnp.stack(boxes_pad).reshape(-1)     # [N * M_PAD * 4]
        labels_flat = jnp.stack(labels_pad).reshape(-1)   # [N * M_PAD]
        nb_arr = jnp.asarray(m_list, jnp.int32)           # [N]

        cls_part, reg_part, np_part = _fused_focal_loss_call(
            nb_arr, boxes_flat, labels_flat, cls_f, reg_f, anc_f,
            num_x=num_x, m_pad=m_pad, alpha=self.alpha, gamma=self.gamma,
            divide_line=self.divide_line)

        cls_sums = jnp.sum(cls_part, axis=(1, 2, 3))      # [N]
        reg_sums = jnp.sum(reg_part, axis=(1, 2, 3))      # [N]
        num_pos = jnp.sum(np_part, axis=(1, 2, 3))        # [N]

        # Per-target normalization, vectorized.  Matches the reference exactly: no
        # clamp on num_pos (a target with boxes but zero positives divides by zero,
        # just like the PyTorch code); empty targets keep the raw focal sum and 0 reg.
        has_boxes = nb_arr > 0
        class_per = jnp.where(has_boxes, cls_sums / num_pos, cls_sums)
        reg_per = jnp.where(has_boxes, reg_sums / (num_pos * 4.0), 0.0)
        # TODO(synk): the reference mutates `anchors = anchors[positive_idxs]` across
        # batch iterations (shape-breaking bug for N > 1); fresh anchors are used here.
        return {'class_loss': jnp.mean(class_per), 'reg_loss ': jnp.mean(reg_per)}


# -----------------------------------------------------------------------------
# Deterministic small example
# -----------------------------------------------------------------------------
if __name__ == "__main__":
    key = jax.random.PRNGKey(0)
    k1, k2 = jax.random.split(key)

    N, C = 2, 16
    G = 24                       # 24x24 grid of 16x16 anchors -> NUM_X = 576
    NUM_X = G * G                # (not a multiple of 1024: exercises the padding path)

    classifications = jax.random.uniform(k1, (N, NUM_X, C), jnp.float32, 1e-4, 1.0 - 1e-4)
    regressions = 0.1 * jax.random.normal(k2, (N, NUM_X, 4), jnp.float32)

    gx, gy = jnp.meshgrid(jnp.arange(G, dtype=jnp.float32),
                          jnp.arange(G, dtype=jnp.float32), indexing='xy')
    x1 = (gx * 16.0).reshape(-1)
    y1 = (gy * 16.0).reshape(-1)
    anchors = jnp.stack([x1, y1, x1 + 16.0, y1 + 16.0], axis=1)   # [NUM_X, 4]

    targets = [
        {'labels': jnp.array([3, 7, 1], jnp.int32),
         'boxes': anchors[jnp.array([10, 100, 200])]},                              # exact matches
        {'labels': jnp.array([5, 0], jnp.int32),
         'boxes': anchors[jnp.array([5, 50])] + jnp.array([2.0, 2.0, 2.0, 2.0])},   # IoU ~ 0.62
    ]

    loss_fn = FocalLoss(alpha=0.25, gamma=2, divide_line=1.0 / 9)
    out = loss_fn(classifications, regressions, anchors, targets)
    jax.block_until_ready(out['class_loss'])
    jax.block_until_ready(out['reg_loss '])
    print("KERNEL_OK")
</pallas_src>

<mosaic_0001>
module attributes {stable_mosaic.version = 11 : i64} {
  func.func @_fused_kernel(%arg0: i32, %arg1: i32, %arg2: i32, %arg3: memref<2xi32, #tpu.memory_space<smem>>, %arg4: memref<64xf32, #tpu.memory_space<smem>>, %arg5: memref<16xi32, #tpu.memory_space<smem>>, %arg6: memref<1x1x16x8x128xf32, #tpu.memory_space<vmem>>, %arg7: memref<1x1x4x8x128xf32, #tpu.memory_space<vmem>>, %arg8: memref<1x4x8x128xf32, #tpu.memory_space<vmem>>, %arg9: memref<1x1x8x128xf32, #tpu.memory_space<vmem>>, %arg10: memref<1x1x8x128xf32, #tpu.memory_space<vmem>>, %arg11: memref<1x1x8x128xf32, #tpu.memory_space<vmem>>, %arg12: memref<8x128xf32, #tpu.memory_space<vmem>>, %arg13: memref<8x128xf32, #tpu.memory_space<vmem>>, %arg14: memref<8x128xf32, #tpu.memory_space<vmem>>) attributes {dimension_semantics = [#tpu.dimension_semantics<parallel>, #tpu.dimension_semantics<parallel>, #tpu.dimension_semantics<arbitrary>], iteration_bounds = array<i64: 2, 1, 1>, scalar_prefetch = 0 : i64, scratch_operands = 3 : i64, tpu.core_type = #tpu.core_type<tc>, window_params = [{transform_indices = @transform_0, window_bounds = array<i64: 2>}, {transform_indices = @transform_1, window_bounds = array<i64: 64>}, {transform_indices = @transform_2, window_bounds = array<i64: 16>}, {transform_indices = @transform_3, window_bounds = array<i64: 1, 1, 16, 8, 128>}, {transform_indices = @transform_4, window_bounds = array<i64: 1, 1, 4, 8, 128>}, {transform_indices = @transform_5, window_bounds = array<i64: 1, 4, 8, 128>}, {transform_indices = @transform_6, window_bounds = array<i64: 1, 1, 8, 128>}, {transform_indices = @transform_7, window_bounds = array<i64: 1, 1, 8, 128>}, {transform_indices = @transform_8, window_bounds = array<i64: 1, 1, 8, 128>}]} {
    %c0_i32 = arith.constant 0 : i32
    %0 = arith.cmpi eq, %arg2, %c0_i32 : i32
    %1 = arith.extui %0 : i1 to i32
    %c0_i32_0 = arith.constant 0 : i32
    %2 = arith.cmpi ne, %1, %c0_i32_0 : i32
    scf.if %2 {
      %cst_153 = arith.constant 0.000000e+00 : f32
      %636 = vector.broadcast %cst_153 : f32 to vector<8x128xf32>
      %c0_154 = arith.constant 0 : index
      %c0_155 = arith.constant 0 : index
      %637 = vector.load %arg12[%c0_154, %c0_155] : memref<8x128xf32, #tpu.memory_space<vmem>>, vector<8x128xf32>
      tpu.vector_store %arg12[%c0_154, %c0_155], %636 {strides = array<i32>} : memref<8x128xf32, #tpu.memory_space<vmem>>, vector<8x128xf32>,
      %cst_156 = arith.constant 0.000000e+00 : f32
      %638 = vector.broadcast %cst_156 : f32 to vector<8x128xf32>
      %c0_157 = arith.constant 0 : index
      %c0_158 = arith.constant 0 : index
      %639 = vector.load %arg13[%c0_157, %c0_158] : memref<8x128xf32, #tpu.memory_space<vmem>>, vector<8x128xf32>
      tpu.vector_store %arg13[%c0_157, %c0_158], %638 {strides = array<i32>} : memref<8x128xf32, #tpu.memory_space<vmem>>, vector<8x128xf32>,
      %cst_159 = arith.constant 0.000000e+00 : f32
      %640 = vector.broadcast %cst_159 : f32 to vector<8x128xf32>
      %c0_160 = arith.constant 0 : index
      %c0_161 = arith.constant 0 : index
      %641 = vector.load %arg14[%c0_160, %c0_161] : memref<8x128xf32, #tpu.memory_space<vmem>>, vector<8x128xf32>
      tpu.vector_store %arg14[%c0_160, %c0_161], %640 {strides = array<i32>} : memref<8x128xf32, #tpu.memory_space<vmem>>, vector<8x128xf32>,
    } else {
    }
    %3 = arith.index_cast %arg0 : i32 to index
    %4 = memref.load %arg3[%3] : memref<2xi32, #tpu.memory_space<smem>>
    %c1_i32 = arith.constant 1 : i32
    %5 = arith.muli %arg1, %c1_i32 : i32
    %6 = arith.addi %5, %arg2 : i32
    %c1_i32_1 = arith.constant 1 : i32
    %7 = arith.muli %6, %c1_i32_1 : i32
    %8 = tpu.iota {dimensions = array<i32: 0>} : vector<8x128xi32>
    %9 = tpu.iota {dimensions = array<i32: 1>} : vector<8x128xi32>
    %10 = tpu.iota {dimensions = array<i32: 0>} : vector<16x8x128xi32>
    %c0_i32_2 = arith.constant 0 : i32
    %c1_i32_3 = arith.constant 1 : i32
    %11 = arith.muli %c0_i32_2, %c1_i32_3 : i32
    %c0_i32_4 = arith.constant 0 : i32
    %12 = arith.addi %c0_i32_4, %11 : i32
    %13 = arith.index_cast %12 : i32 to index
    %c0 = arith.constant 0 : index
    %c0_5 = arith.constant 0 : index
    %c0_6 = arith.constant 0 : index
    %14 = vector.load %arg8[%13, %c0, %c0_5, %c0_6] : memref<1x4x8x128xf32, #tpu.memory_space<vmem>>, vector<1x4x8x128xf32>
    %15 = vector.shape_cast %14 : vector<1x4x8x128xf32> to vector<4x8x128xf32>
    %16 = vector.extract_strided_slice %15 {offsets = [0, 0, 0], sizes = [1, 8, 128], strides = [1, 1, 1]} : vector<4x8x128xf32> to vector<1x8x128xf32>
    %17 = vector.shape_cast %16 : vector<1x8x128xf32> to vector<8x128xf32>
    %18 = vector.extract_strided_slice %15 {offsets = [1, 0, 0], sizes = [1, 8, 128], strides = [1, 1, 1]} : vector<4x8x128xf32> to vector<1x8x128xf32>
    %19 = vector.shape_cast %18 : vector<1x8x128xf32> to vector<8x128xf32>
    %20 = vector.extract_strided_slice %15 {offsets = [2, 0, 0], sizes = [1, 8, 128], strides = [1, 1, 1]} : vector<4x8x128xf32> to vector<1x8x128xf32>
    %21 = vector.shape_cast %20 : vector<1x8x128xf32> to vector<8x128xf32>
    %22 = vector.extract_strided_slice %15 {offsets = [3, 0, 0], sizes = [1, 8, 128], strides = [1, 1, 1]} : vector<4x8x128xf32> to vector<1x8x128xf32>
    %23 = vector.shape_cast %22 : vector<1x8x128xf32> to vector<8x128xf32>
    %24 = arith.subf %21, %17 : vector<8x128xf32>
    %25 = arith.subf %23, %19 : vector<8x128xf32>
    %26 = arith.mulf %24, %25 : vector<8x128xf32>
    %cst = arith.constant -1.000000e+00 : f32
    %27 = vector.broadcast %cst : f32 to vector<8x128xf32>
    %c0_i32_7 = arith.constant 0 : i32
    %28 = vector.broadcast %c0_i32_7 : i32 to vector<8x128xi32>
    %c8_i32 = arith.constant 8 : i32
    %29 = arith.muli %arg0, %c8_i32 : i32
    %c0_i32_8 = arith.constant 0 : i32
    %30 = arith.addi %29, %c0_i32_8 : i32
    %c4_i32 = arith.constant 4 : i32
    %31 = arith.muli %30, %c4_i32 : i32
    %c0_i32_9 = arith.constant 0 : i32
    %32 = arith.addi %31, %c0_i32_9 : i32
    %33 = arith.index_cast %32 : i32 to index
    %34 = memref.load %arg4[%33] : memref<64xf32, #tpu.memory_space<smem>>
    %c1_i32_10 = arith.constant 1 : i32
    %35 = arith.addi %31, %c1_i32_10 : i32
    %36 = arith.index_cast %35 : i32 to index
    %37 = memref.load %arg4[%36] : memref<64xf32, #tpu.memory_space<smem>>
    %c2_i32 = arith.constant 2 : i32
    %38 = arith.addi %31, %c2_i32 : i32
    %39 = arith.index_cast %38 : i32 to index
    %40 = memref.load %arg4[%39] : memref<64xf32, #tpu.memory_space<smem>>
    %c3_i32 = arith.constant 3 : i32
    %41 = arith.addi %31, %c3_i32 : i32
    %42 = arith.index_cast %41 : i32 to index
    %43 = memref.load %arg4[%42] : memref<64xf32, #tpu.memory_space<smem>>
    %c8_i32_11 = arith.constant 8 : i32
    %44 = arith.muli %arg0, %c8_i32_11 : i32
    %c0_i32_12 = arith.constant 0 : i32
    %45 = arith.addi %44, %c0_i32_12 : i32
    %46 = arith.index_cast %45 : i32 to index
    %47 = memref.load %arg5[%46] : memref<16xi32, #tpu.memory_space<smem>>
    %48 = vector.broadcast %40 : f32 to vector<8x128xf32>
    %49 = arith.minimumf %21, %48 : vector<8x128xf32>
    %50 = vector.broadcast %34 : f32 to vector<8x128xf32>
    %51 = arith.maximumf %17, %50 : vector<8x128xf32>
    %52 = arith.subf %49, %51 : vector<8x128xf32>
    %cst_13 = arith.constant 0.000000e+00 : f32
    %53 = vector.broadcast %cst_13 : f32 to vector<8x128xf32>
    %54 = arith.maximumf %52, %53 : vector<8x128xf32>
    %55 = vector.broadcast %43 : f32 to vector<8x128xf32>
    %56 = arith.minimumf %23, %55 : vector<8x128xf32>
    %57 = vector.broadcast %37 : f32 to vector<8x128xf32>
    %58 = arith.maximumf %19, %57 : vector<8x128xf32>
    %59 = arith.subf %56, %58 : vector<8x128xf32>
    %cst_14 = arith.constant 0.000000e+00 : f32
    %60 = vector.broadcast %cst_14 : f32 to vector<8x128xf32>
    %61 = arith.maximumf %59, %60 : vector<8x128xf32>
    %62 = arith.mulf %54, %61 : vector<8x128xf32>
    %63 = arith.subf %40, %34 : f32
    %64 = arith.subf %43, %37 : f32
    %65 = arith.mulf %63, %64 : f32
    %66 = vector.broadcast %65 : f32 to vector<8x128xf32>
    %67 = arith.addf %26, %66 : vector<8x128xf32>
    %68 = arith.subf %67, %62 : vector<8x128xf32>
    %69 = arith.divf %62, %68 : vector<8x128xf32>
    %70 = arith.cmpf ogt, %69, %27 : vector<8x128xf32>
    %c0_i32_15 = arith.constant 0 : i32
    %71 = arith.cmpi sgt, %4, %c0_i32_15 : i32
    %72 = vector.broadcast %71 : i1 to vector<8x128xi1>
    %73 = arith.andi %70, %72 : vector<8x128xi1>
    %74 = arith.select %73, %69, %27 : vector<8x128xi1>, vector<8x128xf32>
    %75 = vector.broadcast %47 : i32 to vector<8x128xi32>
    %76 = arith.select %73, %75, %28 : vector<8x128xi1>, vector<8x128xi32>
    %77 = vector.broadcast %34 : f32 to vector<8x128xf32>
    %78 = arith.select %73, %77, %17 : vector<8x128xi1>, vector<8x128xf32>
    %79 = vector.broadcast %37 : f32 to vector<8x128xf32>
    %80 = arith.select %73, %79, %19 : vector<8x128xi1>, vector<8x128xf32>
    %81 = vector.broadcast %40 : f32 to vector<8x128xf32>
    %82 = arith.select %73, %81, %21 : vector<8x128xi1>, vector<8x128xf32>
    %83 = vector.broadcast %43 : f32 to vector<8x128xf32>
    %84 = arith.select %73, %83, %23 : vector<8x128xi1>, vector<8x128xf32>
    %c8_i32_16 = arith.constant 8 : i32
    %85 = arith.muli %arg0, %c8_i32_16 : i32
    %c1_i32_17 = arith.constant 1 : i32
    %86 = arith.addi %85, %c1_i32_17 : i32
    %c4_i32_18 = arith.constant 4 : i32
    %87 = arith.muli %86, %c4_i32_18 : i32
    %c0_i32_19 = arith.constant 0 : i32
    %88 = arith.addi %87, %c0_i32_19 : i32
    %89 = arith.index_cast %88 : i32 to index
    %90 = memref.load %arg4[%89] : memref<64xf32, #tpu.memory_space<smem>>
    %c1_i32_20 = arith.constant 1 : i32
    %91 = arith.addi %87, %c1_i32_20 : i32
    %92 = arith.index_cast %91 : i32 to index
    %93 = memref.load %arg4[%92] : memref<64xf32, #tpu.memory_space<smem>>
    %c2_i32_21 = arith.constant 2 : i32
    %94 = arith.addi %87, %c2_i32_21 : i32
    %95 = arith.index_cast %94 : i32 to index
    %96 = memref.load %arg4[%95] : memref<64xf32, #tpu.memory_space<smem>>
    %c3_i32_22 = arith.constant 3 : i32
    %97 = arith.addi %87, %c3_i32_22 : i32
    %98 = arith.index_cast %97 : i32 to index
    %99 = memref.load %arg4[%98] : memref<64xf32, #tpu.memory_space<smem>>
    %c8_i32_23 = arith.constant 8 : i32
    %100 = arith.muli %arg0, %c8_i32_23 : i32
    %c1_i32_24 = arith.constant 1 : i32
    %101 = arith.addi %100, %c1_i32_24 : i32
    %102 = arith.index_cast %101 : i32 to index
    %103 = memref.load %arg5[%102] : memref<16xi32, #tpu.memory_space<smem>>
    %104 = vector.broadcast %96 : f32 to vector<8x128xf32>
    %105 = arith.minimumf %21, %104 : vector<8x128xf32>
    %106 = vector.broadcast %90 : f32 to vector<8x128xf32>
    %107 = arith.maximumf %17, %106 : vector<8x128xf32>
    %108 = arith.subf %105, %107 : vector<8x128xf32>
    %cst_25 = arith.constant 0.000000e+00 : f32
    %109 = vector.broadcast %cst_25 : f32 to vector<8x128xf32>
    %110 = arith.maximumf %108, %109 : vector<8x128xf32>
    %111 = vector.broadcast %99 : f32 to vector<8x128xf32>
    %112 = arith.minimumf %23, %111 : vector<8x128xf32>
    %113 = vector.broadcast %93 : f32 to vector<8x128xf32>
    %114 = arith.maximumf %19, %113 : vector<8x128xf32>
    %115 = arith.subf %112, %114 : vector<8x128xf32>
    %cst_26 = arith.constant 0.000000e+00 : f32
    %116 = vector.broadcast %cst_26 : f32 to vector<8x128xf32>
    %117 = arith.maximumf %115, %116 : vector<8x128xf32>
    %118 = arith.mulf %110, %117 : vector<8x128xf32>
    %119 = arith.subf %96, %90 : f32
    %120 = arith.subf %99, %93 : f32
    %121 = arith.mulf %119, %120 : f32
    %122 = vector.broadcast %121 : f32 to vector<8x128xf32>
    %123 = arith.addf %26, %122 : vector<8x128xf32>
    %124 = arith.subf %123, %118 : vector<8x128xf32>
    %125 = arith.divf %118, %124 : vector<8x128xf32>
    %126 = arith.cmpf ogt, %125, %74 : vector<8x128xf32>
    %c1_i32_27 = arith.constant 1 : i32
    %127 = arith.cmpi sgt, %4, %c1_i32_27 : i32
    %128 = vector.broadcast %127 : i1 to vector<8x128xi1>
    %129 = arith.andi %126, %128 : vector<8x128xi1>
    %130 = arith.select %129, %125, %74 : vector<8x128xi1>, vector<8x128xf32>
    %131 = vector.broadcast %103 : i32 to vector<8x128xi32>
    %132 = arith.select %129, %131, %76 : vector<8x128xi1>, vector<8x128xi32>
    %133 = vector.broadcast %90 : f32 to vector<8x128xf32>
    %134 = arith.select %129, %133, %78 : vector<8x128xi1>, vector<8x128xf32>
    %135 = vector.broadcast %93 : f32 to vector<8x128xf32>
    %136 = arith.select %129, %135, %80 : vector<8x128xi1>, vector<8x128xf32>
    %137 = vector.broadcast %96 : f32 to vector<8x128xf32>
    %138 = arith.select %129, %137, %82 : vector<8x128xi1>, vector<8x128xf32>
    %139 = vector.broadcast %99 : f32 to vector<8x128xf32>
    %140 = arith.select %129, %139, %84 : vector<8x128xi1>, vector<8x128xf32>
    %c8_i32_28 = arith.constant 8 : i32
    %141 = arith.muli %arg0, %c8_i32_28 : i32
    %c2_i32_29 = arith.constant 2 : i32
    %142 = arith.addi %141, %c2_i32_29 : i32
    %c4_i32_30 = arith.constant 4 : i32
    %143 = arith.muli %142, %c4_i32_30 : i32
    %c0_i32_31 = arith.constant 0 : i32
    %144 = arith.addi %143, %c0_i32_31 : i32
    %145 = arith.index_cast %144 : i32 to index
    %146 = memref.load %arg4[%145] : memref<64xf32, #tpu.memory_space<smem>>
    %c1_i32_32 = arith.constant 1 : i32
    %147 = arith.addi %143, %c1_i32_32 : i32
    %148 = arith.index_cast %147 : i32 to index
    %149 = memref.load %arg4[%148] : memref<64xf32, #tpu.memory_space<smem>>
    %c2_i32_33 = arith.constant 2 : i32
    %150 = arith.addi %143, %c2_i32_33 : i32
    %151 = arith.index_cast %150 : i32 to index
    %152 = memref.load %arg4[%151] : memref<64xf32, #tpu.memory_space<smem>>
    %c3_i32_34 = arith.constant 3 : i32
    %153 = arith.addi %143, %c3_i32_34 : i32
    %154 = arith.index_cast %153 : i32 to index
    %155 = memref.load %arg4[%154] : memref<64xf32, #tpu.memory_space<smem>>
    %c8_i32_35 = arith.constant 8 : i32
    %156 = arith.muli %arg0, %c8_i32_35 : i32
    %c2_i32_36 = arith.constant 2 : i32
    %157 = arith.addi %156, %c2_i32_36 : i32
    %158 = arith.index_cast %157 : i32 to index
    %159 = memref.load %arg5[%158] : memref<16xi32, #tpu.memory_space<smem>>
    %160 = vector.broadcast %152 : f32 to vector<8x128xf32>
    %161 = arith.minimumf %21, %160 : vector<8x128xf32>
    %162 = vector.broadcast %146 : f32 to vector<8x128xf32>
    %163 = arith.maximumf %17, %162 : vector<8x128xf32>
    %164 = arith.subf %161, %163 : vector<8x128xf32>
    %cst_37 = arith.constant 0.000000e+00 : f32
    %165 = vector.broadcast %cst_37 : f32 to vector<8x128xf32>
    %166 = arith.maximumf %164, %165 : vector<8x128xf32>
    %167 = vector.broadcast %155 : f32 to vector<8x128xf32>
    %168 = arith.minimumf %23, %167 : vector<8x128xf32>
    %169 = vector.broadcast %149 : f32 to vector<8x128xf32>
    %170 = arith.maximumf %19, %169 : vector<8x128xf32>
    %171 = arith.subf %168, %170 : vector<8x128xf32>
    %cst_38 = arith.constant 0.000000e+00 : f32
    %172 = vector.broadcast %cst_38 : f32 to vector<8x128xf32>
    %173 = arith.maximumf %171, %172 : vector<8x128xf32>
    %174 = arith.mulf %166, %173 : vector<8x128xf32>
    %175 = arith.subf %152, %146 : f32
    %176 = arith.subf %155, %149 : f32
    %177 = arith.mulf %175, %176 : f32
    %178 = vector.broadcast %177 : f32 to vector<8x128xf32>
    %179 = arith.addf %26, %178 : vector<8x128xf32>
    %180 = arith.subf %179, %174 : vector<8x128xf32>
    %181 = arith.divf %174, %180 : vector<8x128xf32>
    %182 = arith.cmpf ogt, %181, %130 : vector<8x128xf32>
    %c2_i32_39 = arith.constant 2 : i32
    %183 = arith.cmpi sgt, %4, %c2_i32_39 : i32
    %184 = vector.broadcast %183 : i1 to vector<8x128xi1>
    %185 = arith.andi %182, %184 : vector<8x128xi1>
    %186 = arith.select %185, %181, %130 : vector<8x128xi1>, vector<8x128xf32>
    %187 = vector.broadcast %159 : i32 to vector<8x128xi32>
    %188 = arith.select %185, %187, %132 : vector<8x128xi1>, vector<8x128xi32>
    %189 = vector.broadcast %146 : f32 to vector<8x128xf32>
    %190 = arith.select %185, %189, %134 : vector<8x128xi1>, vector<8x128xf32>
    %191 = vector.broadcast %149 : f32 to vector<8x128xf32>
    %192 = arith.select %185, %191, %136 : vector<8x128xi1>, vector<8x128xf32>
    %193 = vector.broadcast %152 : f32 to vector<8x128xf32>
    %194 = arith.select %185, %193, %138 : vector<8x128xi1>, vector<8x128xf32>
    %195 = vector.broadcast %155 : f32 to vector<8x128xf32>
    %196 = arith.select %185, %195, %140 : vector<8x128xi1>, vector<8x128xf32>
    %c8_i32_40 = arith.constant 8 : i32
    %197 = arith.muli %arg0, %c8_i32_40 : i32
    %c3_i32_41 = arith.constant 3 : i32
    %198 = arith.addi %197, %c3_i32_41 : i32
    %c4_i32_42 = arith.constant 4 : i32
    %199 = arith.muli %198, %c4_i32_42 : i32
    %c0_i32_43 = arith.constant 0 : i32
    %200 = arith.addi %199, %c0_i32_43 : i32
    %201 = arith.index_cast %200 : i32 to index
    %202 = memref.load %arg4[%201] : memref<64xf32, #tpu.memory_space<smem>>
    %c1_i32_44 = arith.constant 1 : i32
    %203 = arith.addi %199, %c1_i32_44 : i32
    %204 = arith.index_cast %203 : i32 to index
    %205 = memref.load %arg4[%204] : memref<64xf32, #tpu.memory_space<smem>>
    %c2_i32_45 = arith.constant 2 : i32
    %206 = arith.addi %199, %c2_i32_45 : i32
    %207 = arith.index_cast %206 : i32 to index
    %208 = memref.load %arg4[%207] : memref<64xf32, #tpu.memory_space<smem>>
    %c3_i32_46 = arith.constant 3 : i32
    %209 = arith.addi %199, %c3_i32_46 : i32
    %210 = arith.index_cast %209 : i32 to index
    %211 = memref.load %arg4[%210] : memref<64xf32, #tpu.memory_space<smem>>
    %c8_i32_47 = arith.constant 8 : i32
    %212 = arith.muli %arg0, %c8_i32_47 : i32
    %c3_i32_48 = arith.constant 3 : i32
    %213 = arith.addi %212, %c3_i32_48 : i32
    %214 = arith.index_cast %213 : i32 to index
    %215 = memref.load %arg5[%214] : memref<16xi32, #tpu.memory_space<smem>>
    %216 = vector.broadcast %208 : f32 to vector<8x128xf32>
    %217 = arith.minimumf %21, %216 : vector<8x128xf32>
    %218 = vector.broadcast %202 : f32 to vector<8x128xf32>
    %219 = arith.maximumf %17, %218 : vector<8x128xf32>
    %220 = arith.subf %217, %219 : vector<8x128xf32>
    %cst_49 = arith.constant 0.000000e+00 : f32
    %221 = vector.broadcast %cst_49 : f32 to vector<8x128xf32>
    %222 = arith.maximumf %220, %221 : vector<8x128xf32>
    %223 = vector.broadcast %211 : f32 to vector<8x128xf32>
    %224 = arith.minimumf %23, %223 : vector<8x128xf32>
    %225 = vector.broadcast %205 : f32 to vector<8x128xf32>
    %226 = arith.maximumf %19, %225 : vector<8x128xf32>
    %227 = arith.subf %224, %226 : vector<8x128xf32>
    %cst_50 = arith.constant 0.000000e+00 : f32
    %228 = vector.broadcast %cst_50 : f32 to vector<8x128xf32>
    %229 = arith.maximumf %227, %228 : vector<8x128xf32>
    %230 = arith.mulf %222, %229 : vector<8x128xf32>
    %231 = arith.subf %208, %202 : f32
    %232 = arith.subf %211, %205 : f32
    %233 = arith.mulf %231, %232 : f32
    %234 = vector.broadcast %233 : f32 to vector<8x128xf32>
    %235 = arith.addf %26, %234 : vector<8x128xf32>
    %236 = arith.subf %235, %230 : vector<8x128xf32>
    %237 = arith.divf %230, %236 : vector<8x128xf32>
    %238 = arith.cmpf ogt, %237, %186 : vector<8x128xf32>
    %c3_i32_51 = arith.constant 3 : i32
    %239 = arith.cmpi sgt, %4, %c3_i32_51 : i32
    %240 = vector.broadcast %239 : i1 to vector<8x128xi1>
    %241 = arith.andi %238, %240 : vector<8x128xi1>
    %242 = arith.select %241, %237, %186 : vector<8x128xi1>, vector<8x128xf32>
    %243 = vector.broadcast %215 : i32 to vector<8x128xi32>
    %244 = arith.select %241, %243, %188 : vector<8x128xi1>, vector<8x128xi32>
    %245 = vector.broadcast %202 : f32 to vector<8x128xf32>
    %246 = arith.select %241, %245, %190 : vector<8x128xi1>, vector<8x128xf32>
    %247 = vector.broadcast %205 : f32 to vector<8x128xf32>
    %248 = arith.select %241, %247, %192 : vector<8x128xi1>, vector<8x128xf32>
    %249 = vector.broadcast %208 : f32 to vector<8x128xf32>
    %250 = arith.select %241, %249, %194 : vector<8x128xi1>, vector<8x128xf32>
    %251 = vector.broadcast %211 : f32 to vector<8x128xf32>
    %252 = arith.select %241, %251, %196 : vector<8x128xi1>, vector<8x128xf32>
    %c8_i32_52 = arith.constant 8 : i32
    %253 = arith.muli %arg0, %c8_i32_52 : i32
    %c4_i32_53 = arith.constant 4 : i32
    %254 = arith.addi %253, %c4_i32_53 : i32
    %c4_i32_54 = arith.constant 4 : i32
    %255 = arith.muli %254, %c4_i32_54 : i32
    %c0_i32_55 = arith.constant 0 : i32
    %256 = arith.addi %255, %c0_i32_55 : i32
    %257 = arith.index_cast %256 : i32 to index
    %258 = memref.load %arg4[%257] : memref<64xf32, #tpu.memory_space<smem>>
    %c1_i32_56 = arith.constant 1 : i32
    %259 = arith.addi %255, %c1_i32_56 : i32
    %260 = arith.index_cast %259 : i32 to index
    %261 = memref.load %arg4[%260] : memref<64xf32, #tpu.memory_space<smem>>
    %c2_i32_57 = arith.constant 2 : i32
    %262 = arith.addi %255, %c2_i32_57 : i32
    %263 = arith.index_cast %262 : i32 to index
    %264 = memref.load %arg4[%263] : memref<64xf32, #tpu.memory_space<smem>>
    %c3_i32_58 = arith.constant 3 : i32
    %265 = arith.addi %255, %c3_i32_58 : i32
    %266 = arith.index_cast %265 : i32 to index
    %267 = memref.load %arg4[%266] : memref<64xf32, #tpu.memory_space<smem>>
    %c8_i32_59 = arith.constant 8 : i32
    %268 = arith.muli %arg0, %c8_i32_59 : i32
    %c4_i32_60 = arith.constant 4 : i32
    %269 = arith.addi %268, %c4_i32_60 : i32
    %270 = arith.index_cast %269 : i32 to index
    %271 = memref.load %arg5[%270] : memref<16xi32, #tpu.memory_space<smem>>
    %272 = vector.broadcast %264 : f32 to vector<8x128xf32>
    %273 = arith.minimumf %21, %272 : vector<8x128xf32>
    %274 = vector.broadcast %258 : f32 to vector<8x128xf32>
    %275 = arith.maximumf %17, %274 : vector<8x128xf32>
    %276 = arith.subf %273, %275 : vector<8x128xf32>
    %cst_61 = arith.constant 0.000000e+00 : f32
    %277 = vector.broadcast %cst_61 : f32 to vector<8x128xf32>
    %278 = arith.maximumf %276, %277 : vector<8x128xf32>
    %279 = vector.broadcast %267 : f32 to vector<8x128xf32>
    %280 = arith.minimumf %23, %279 : vector<8x128xf32>
    %281 = vector.broadcast %261 : f32 to vector<8x128xf32>
    %282 = arith.maximumf %19, %281 : vector<8x128xf32>
    %283 = arith.subf %280, %282 : vector<8x128xf32>
    %cst_62 = arith.constant 0.000000e+00 : f32
    %284 = vector.broadcast %cst_62 : f32 to vector<8x128xf32>
    %285 = arith.maximumf %283, %284 : vector<8x128xf32>
    %286 = arith.mulf %278, %285 : vector<8x128xf32>
    %287 = arith.subf %264, %258 : f32
    %288 = arith.subf %267, %261 : f32
    %289 = arith.mulf %287, %288 : f32
    %290 = vector.broadcast %289 : f32 to vector<8x128xf32>
    %291 = arith.addf %26, %290 : vector<8x128xf32>
    %292 = arith.subf %291, %286 : vector<8x128xf32>
    %293 = arith.divf %286, %292 : vector<8x128xf32>
    %294 = arith.cmpf ogt, %293, %242 : vector<8x128xf32>
    %c4_i32_63 = arith.constant 4 : i32
    %295 = arith.cmpi sgt, %4, %c4_i32_63 : i32
    %296 = vector.broadcast %295 : i1 to vector<8x128xi1>
    %297 = arith.andi %294, %296 : vector<8x128xi1>
    %298 = arith.select %297, %293, %242 : vector<8x128xi1>, vector<8x128xf32>
    %299 = vector.broadcast %271 : i32 to vector<8x128xi32>
    %300 = arith.select %297, %299, %244 : vector<8x128xi1>, vector<8x128xi32>
    %301 = vector.broadcast %258 : f32 to vector<8x128xf32>
    %302 = arith.select %297, %301, %246 : vector<8x128xi1>, vector<8x128xf32>
    %303 = vector.broadcast %261 : f32 to vector<8x128xf32>
    %304 = arith.select %297, %303, %248 : vector<8x128xi1>, vector<8x128xf32>
    %305 = vector.broadcast %264 : f32 to vector<8x128xf32>
    %306 = arith.select %297, %305, %250 : vector<8x128xi1>, vector<8x128xf32>
    %307 = vector.broadcast %267 : f32 to vector<8x128xf32>
    %308 = arith.select %297, %307, %252 : vector<8x128xi1>, vector<8x128xf32>
    %c8_i32_64 = arith.constant 8 : i32
    %309 = arith.muli %arg0, %c8_i32_64 : i32
    %c5_i32 = arith.constant 5 : i32
    %310 = arith.addi %309, %c5_i32 : i32
    %c4_i32_65 = arith.constant 4 : i32
    %311 = arith.muli %310, %c4_i32_65 : i32
    %c0_i32_66 = arith.constant 0 : i32
    %312 = arith.addi %311, %c0_i32_66 : i32
    %313 = arith.index_cast %312 : i32 to index
    %314 = memref.load %arg4[%313] : memref<64xf32, #tpu.memory_space<smem>>
    %c1_i32_67 = arith.constant 1 : i32
    %315 = arith.addi %311, %c1_i32_67 : i32
    %316 = arith.index_cast %315 : i32 to index
    %317 = memref.load %arg4[%316] : memref<64xf32, #tpu.memory_space<smem>>
    %c2_i32_68 = arith.constant 2 : i32
    %318 = arith.addi %311, %c2_i32_68 : i32
    %319 = arith.index_cast %318 : i32 to index
    %320 = memref.load %arg4[%319] : memref<64xf32, #tpu.memory_space<smem>>
    %c3_i32_69 = arith.constant 3 : i32
    %321 = arith.addi %311, %c3_i32_69 : i32
    %322 = arith.index_cast %321 : i32 to index
    %323 = memref.load %arg4[%322] : memref<64xf32, #tpu.memory_space<smem>>
    %c8_i32_70 = arith.constant 8 : i32
    %324 = arith.muli %arg0, %c8_i32_70 : i32
    %c5_i32_71 = arith.constant 5 : i32
    %325 = arith.addi %324, %c5_i32_71 : i32
    %326 = arith.index_cast %325 : i32 to index
    %327 = memref.load %arg5[%326] : memref<16xi32, #tpu.memory_space<smem>>
    %328 = vector.broadcast %320 : f32 to vector<8x128xf32>
    %329 = arith.minimumf %21, %328 : vector<8x128xf32>
    %330 = vector.broadcast %314 : f32 to vector<8x128xf32>
    %331 = arith.maximumf %17, %330 : vector<8x128xf32>
    %332 = arith.subf %329, %331 : vector<8x128xf32>
    %cst_72 = arith.constant 0.000000e+00 : f32
    %333 = vector.broadcast %cst_72 : f32 to vector<8x128xf32>
    %334 = arith.maximumf %332, %333 : vector<8x128xf32>
    %335 = vector.broadcast %323 : f32 to vector<8x128xf32>
    %336 = arith.minimumf %23, %335 : vector<8x128xf32>
    %337 = vector.broadcast %317 : f32 to vector<8x128xf32>
    %338 = arith.maximumf %19, %337 : vector<8x128xf32>
    %339 = arith.subf %336, %338 : vector<8x128xf32>
    %cst_73 = arith.constant 0.000000e+00 : f32
    %340 = vector.broadcast %cst_73 : f32 to vector<8x128xf32>
    %341 = arith.maximumf %339, %340 : vector<8x128xf32>
    %342 = arith.mulf %334, %341 : vector<8x128xf32>
    %343 = arith.subf %320, %314 : f32
    %344 = arith.subf %323, %317 : f32
    %345 = arith.mulf %343, %344 : f32
    %346 = vector.broadcast %345 : f32 to vector<8x128xf32>
    %347 = arith.addf %26, %346 : vector<8x128xf32>
    %348 = arith.subf %347, %342 : vector<8x128xf32>
    %349 = arith.divf %342, %348 : vector<8x128xf32>
    %350 = arith.cmpf ogt, %349, %298 : vector<8x128xf32>
    %c5_i32_74 = arith.constant 5 : i32
    %351 = arith.cmpi sgt, %4, %c5_i32_74 : i32
    %352 = vector.broadcast %351 : i1 to vector<8x128xi1>
    %353 = arith.andi %350, %352 : vector<8x128xi1>
    %354 = arith.select %353, %349, %298 : vector<8x128xi1>, vector<8x128xf32>
    %355 = vector.broadcast %327 : i32 to vector<8x128xi32>
    %356 = arith.select %353, %355, %300 : vector<8x128xi1>, vector<8x128xi32>
    %357 = vector.broadcast %314 : f32 to vector<8x128xf32>
    %358 = arith.select %353, %357, %302 : vector<8x128xi1>, vector<8x128xf32>
    %359 = vector.broadcast %317 : f32 to vector<8x128xf32>
    %360 = arith.select %353, %359, %304 : vector<8x128xi1>, vector<8x128xf32>
    %361 = vector.broadcast %320 : f32 to vector<8x128xf32>
    %362 = arith.select %353, %361, %306 : vector<8x128xi1>, vector<8x128xf32>
    %363 = vector.broadcast %323 : f32 to vector<8x128xf32>
    %364 = arith.select %353, %363, %308 : vector<8x128xi1>, vector<8x128xf32>
    %c8_i32_75 = arith.constant 8 : i32
    %365 = arith.muli %arg0, %c8_i32_75 : i32
    %c6_i32 = arith.constant 6 : i32
    %366 = arith.addi %365, %c6_i32 : i32
    %c4_i32_76 = arith.constant 4 : i32
    %367 = arith.muli %366, %c4_i32_76 : i32
    %c0_i32_77 = arith.constant 0 : i32
    %368 = arith.addi %367, %c0_i32_77 : i32
    %369 = arith.index_cast %368 : i32 to index
    %370 = memref.load %arg4[%369] : memref<64xf32, #tpu.memory_space<smem>>
    %c1_i32_78 = arith.constant 1 : i32
    %371 = arith.addi %367, %c1_i32_78 : i32
    %372 = arith.index_cast %371 : i32 to index
    %373 = memref.load %arg4[%372] : memref<64xf32, #tpu.memory_space<smem>>
    %c2_i32_79 = arith.constant 2 : i32
    %374 = arith.addi %367, %c2_i32_79 : i32
    %375 = arith.index_cast %374 : i32 to index
    %376 = memref.load %arg4[%375] : memref<64xf32, #tpu.memory_space<smem>>
    %c3_i32_80 = arith.constant 3 : i32
    %377 = arith.addi %367, %c3_i32_80 : i32
    %378 = arith.index_cast %377 : i32 to index
    %379 = memref.load %arg4[%378] : memref<64xf32, #tpu.memory_space<smem>>
    %c8_i32_81 = arith.constant 8 : i32
    %380 = arith.muli %arg0, %c8_i32_81 : i32
    %c6_i32_82 = arith.constant 6 : i32
    %381 = arith.addi %380, %c6_i32_82 : i32
    %382 = arith.index_cast %381 : i32 to index
    %383 = memref.load %arg5[%382] : memref<16xi32, #tpu.memory_space<smem>>
    %384 = vector.broadcast %376 : f32 to vector<8x128xf32>
    %385 = arith.minimumf %21, %384 : vector<8x128xf32>
    %386 = vector.broadcast %370 : f32 to vector<8x128xf32>
    %387 = arith.maximumf %17, %386 : vector<8x128xf32>
    %388 = arith.subf %385, %387 : vector<8x128xf32>
    %cst_83 = arith.constant 0.000000e+00 : f32
    %389 = vector.broadcast %cst_83 : f32 to vector<8x128xf32>
    %390 = arith.maximumf %388, %389 : vector<8x128xf32>
    %391 = vector.broadcast %379 : f32 to vector<8x128xf32>
    %392 = arith.minimumf %23, %391 : vector<8x128xf32>
    %393 = vector.broadcast %373 : f32 to vector<8x128xf32>
    %394 = arith.maximumf %19, %393 : vector<8x128xf32>
    %395 = arith.subf %392, %394 : vector<8x128xf32>
    %cst_84 = arith.constant 0.000000e+00 : f32
    %396 = vector.broadcast %cst_84 : f32 to vector<8x128xf32>
    %397 = arith.maximumf %395, %396 : vector<8x128xf32>
    %398 = arith.mulf %390, %397 : vector<8x128xf32>
    %399 = arith.subf %376, %370 : f32
    %400 = arith.subf %379, %373 : f32
    %401 = arith.mulf %399, %400 : f32
    %402 = vector.broadcast %401 : f32 to vector<8x128xf32>
    %403 = arith.addf %26, %402 : vector<8x128xf32>
    %404 = arith.subf %403, %398 : vector<8x128xf32>
    %405 = arith.divf %398, %404 : vector<8x128xf32>
    %406 = arith.cmpf ogt, %405, %354 : vector<8x128xf32>
    %c6_i32_85 = arith.constant 6 : i32
    %407 = arith.cmpi sgt, %4, %c6_i32_85 : i32
    %408 = vector.broadcast %407 : i1 to vector<8x128xi1>
    %409 = arith.andi %406, %408 : vector<8x128xi1>
    %410 = arith.select %409, %405, %354 : vector<8x128xi1>, vector<8x128xf32>
    %411 = vector.broadcast %383 : i32 to vector<8x128xi32>
    %412 = arith.select %409, %411, %356 : vector<8x128xi1>, vector<8x128xi32>
    %413 = vector.broadcast %370 : f32 to vector<8x128xf32>
    %414 = arith.select %409, %413, %358 : vector<8x128xi1>, vector<8x128xf32>
    %415 = vector.broadcast %373 : f32 to vector<8x128xf32>
    %416 = arith.select %409, %415, %360 : vector<8x128xi1>, vector<8x128xf32>
    %417 = vector.broadcast %376 : f32 to vector<8x128xf32>
    %418 = arith.select %409, %417, %362 : vector<8x128xi1>, vector<8x128xf32>
    %419 = vector.broadcast %379 : f32 to vector<8x128xf32>
    %420 = arith.select %409, %419, %364 : vector<8x128xi1>, vector<8x128xf32>
    %c8_i32_86 = arith.constant 8 : i32
    %421 = arith.muli %arg0, %c8_i32_86 : i32
    %c7_i32 = arith.constant 7 : i32
    %422 = arith.addi %421, %c7_i32 : i32
    %c4_i32_87 = arith.constant 4 : i32
    %423 = arith.muli %422, %c4_i32_87 : i32
    %c0_i32_88 = arith.constant 0 : i32
    %424 = arith.addi %423, %c0_i32_88 : i32
    %425 = arith.index_cast %424 : i32 to index
    %426 = memref.load %arg4[%425] : memref<64xf32, #tpu.memory_space<smem>>
    %c1_i32_89 = arith.constant 1 : i32
    %427 = arith.addi %423, %c1_i32_89 : i32
    %428 = arith.index_cast %427 : i32 to index
    %429 = memref.load %arg4[%428] : memref<64xf32, #tpu.memory_space<smem>>
    %c2_i32_90 = arith.constant 2 : i32
    %430 = arith.addi %423, %c2_i32_90 : i32
    %431 = arith.index_cast %430 : i32 to index
    %432 = memref.load %arg4[%431] : memref<64xf32, #tpu.memory_space<smem>>
    %c3_i32_91 = arith.constant 3 : i32
    %433 = arith.addi %423, %c3_i32_91 : i32
    %434 = arith.index_cast %433 : i32 to index
    %435 = memref.load %arg4[%434] : memref<64xf32, #tpu.memory_space<smem>>
    %c8_i32_92 = arith.constant 8 : i32
    %436 = arith.muli %arg0, %c8_i32_92 : i32
    %c7_i32_93 = arith.constant 7 : i32
    %437 = arith.addi %436, %c7_i32_93 : i32
    %438 = arith.index_cast %437 : i32 to index
    %439 = memref.load %arg5[%438] : memref<16xi32, #tpu.memory_space<smem>>
    %440 = vector.broadcast %432 : f32 to vector<8x128xf32>
    %441 = arith.minimumf %21, %440 : vector<8x128xf32>
    %442 = vector.broadcast %426 : f32 to vector<8x128xf32>
    %443 = arith.maximumf %17, %442 : vector<8x128xf32>
    %444 = arith.subf %441, %443 : vector<8x128xf32>
    %cst_94 = arith.constant 0.000000e+00 : f32
    %445 = vector.broadcast %cst_94 : f32 to vector<8x128xf32>
    %446 = arith.maximumf %444, %445 : vector<8x128xf32>
    %447 = vector.broadcast %435 : f32 to vector<8x128xf32>
    %448 = arith.minimumf %23, %447 : vector<8x128xf32>
    %449 = vector.broadcast %429 : f32 to vector<8x128xf32>
    %450 = arith.maximumf %19, %449 : vector<8x128xf32>
    %451 = arith.subf %448, %450 : vector<8x128xf32>
    %cst_95 = arith.constant 0.000000e+00 : f32
    %452 = vector.broadcast %cst_95 : f32 to vector<8x128xf32>
    %453 = arith.maximumf %451, %452 : vector<8x128xf32>
    %454 = arith.mulf %446, %453 : vector<8x128xf32>
    %455 = arith.subf %432, %426 : f32
    %456 = arith.subf %435, %429 : f32
    %457 = arith.mulf %455, %456 : f32
    %458 = vector.broadcast %457 : f32 to vector<8x128xf32>
    %459 = arith.addf %26, %458 : vector<8x128xf32>
    %460 = arith.subf %459, %454 : vector<8x128xf32>
    %461 = arith.divf %454, %460 : vector<8x128xf32>
    %462 = arith.cmpf ogt, %461, %410 : vector<8x128xf32>
    %c7_i32_96 = arith.constant 7 : i32
    %463 = arith.cmpi sgt, %4, %c7_i32_96 : i32
    %464 = vector.broadcast %463 : i1 to vector<8x128xi1>
    %465 = arith.andi %462, %464 : vector<8x128xi1>
    %466 = arith.select %465, %461, %410 : vector<8x128xi1>, vector<8x128xf32>
    %467 = vector.broadcast %439 : i32 to vector<8x128xi32>
    %468 = arith.select %465, %467, %412 : vector<8x128xi1>, vector<8x128xi32>
    %469 = vector.broadcast %426 : f32 to vector<8x128xf32>
    %470 = arith.select %465, %469, %414 : vector<8x128xi1>, vector<8x128xf32>
    %471 = vector.broadcast %429 : f32 to vector<8x128xf32>
    %472 = arith.select %465, %471, %416 : vector<8x128xi1>, vector<8x128xf32>
    %473 = vector.broadcast %432 : f32 to vector<8x128xf32>
    %474 = arith.select %465, %473, %418 : vector<8x128xi1>, vector<8x128xf32>
    %475 = vector.broadcast %435 : f32 to vector<8x128xf32>
    %476 = arith.select %465, %475, %420 : vector<8x128xi1>, vector<8x128xf32>
    %477 = arith.addi %7, %12 : i32
    %c1024_i32 = arith.constant 1024 : i32
    %478 = arith.muli %477, %c1024_i32 : i32
    %c128_i32 = arith.constant 128 : i32
    %479 = vector.broadcast %c128_i32 : i32 to vector<8x128xi32>
    %480 = arith.muli %8, %479 : vector<8x128xi32>
    %481 = vector.broadcast %478 : i32 to vector<8x128xi32>
    %482 = arith.addi %481, %480 : vector<8x128xi32>
    %483 = arith.addi %482, %9 : vector<8x128xi32>
    %c576_i32 = arith.constant 576 : i32
    %484 = vector.broadcast %c576_i32 : i32 to vector<8x128xi32>
    %485 = arith.cmpi slt, %483, %484 : vector<8x128xi32>
    %cst_97 = arith.constant 5.000000e-01 : f32
    %486 = vector.broadcast %cst_97 : f32 to vector<8x128xf32>
    %487 = arith.cmpf oge, %466, %486 : vector<8x128xf32>
    %cst_98 = arith.constant 4.000000e-01 : f32
    %488 = vector.broadcast %cst_98 : f32 to vector<8x128xf32>
    %489 = arith.cmpf olt, %466, %488 : vector<8x128xf32>
    %490 = vector.shape_cast %487 : vector<8x128xi1> to vector<1x8x128xi1>
    %491 = vector.shape_cast %468 : vector<8x128xi32> to vector<1x8x128xi32>
    %492 = vector.broadcast %491 : vector<1x8x128xi32> to vector<16x8x128xi32>
    %493 = arith.cmpi eq, %10, %492 : vector<16x8x128xi32>
    %494 = vector.broadcast %490 : vector<1x8x128xi1> to vector<16x8x128xi1>
    %495 = arith.andi %494, %493 : vector<16x8x128xi1>
    %496 = vector.shape_cast %489 : vector<8x128xi1> to vector<1x8x128xi1>
    %497 = vector.broadcast %496 : vector<1x8x128xi1> to vector<16x8x128xi1>
    %498 = arith.ori %497, %495 : vector<16x8x128xi1>
    %499 = vector.shape_cast %485 : vector<8x128xi1> to vector<1x8x128xi1>
    %500 = vector.broadcast %499 : vector<1x8x128xi1> to vector<16x8x128xi1>
    %501 = arith.andi %498, %500 : vector<16x8x128xi1>
    %c0_99 = arith.constant 0 : index
    %502 = arith.index_cast %12 : i32 to index
    %c0_100 = arith.constant 0 : index
    %c0_101 = arith.constant 0 : index
    %c0_102 = arith.constant 0 : index
    %503 = vector.load %arg6[%c0_99, %502, %c0_100, %c0_101, %c0_102] : memref<1x1x16x8x128xf32, #tpu.memory_space<vmem>>, vector<1x1x16x8x128xf32>
    %504 = vector.shape_cast %503 : vector<1x1x16x8x128xf32> to vector<16x8x128xf32>
    %cst_103 = arith.constant 9.99999997E-7 : f32
    %cst_104 = arith.constant 0.999998986 : f32
    %505 = vector.broadcast %cst_103 : f32 to vector<16x8x128xf32>
    %506 = arith.maximumf %505, %504 : vector<16x8x128xf32>
    %507 = vector.broadcast %cst_104 : f32 to vector<16x8x128xf32>
    %508 = arith.minimumf %507, %506 : vector<16x8x128xf32>
    %cst_105 = arith.constant 1.000000e+00 : f32
    %509 = vector.broadcast %cst_105 : f32 to vector<16x8x128xf32>
    %510 = arith.subf %509, %508 : vector<16x8x128xf32>
    %511 = arith.select %495, %508, %510 : vector<16x8x128xi1>, vector<16x8x128xf32>
    %cst_106 = arith.constant 2.500000e-01 : f32
    %cst_107 = arith.constant 7.500000e-01 : f32
    %512 = vector.broadcast %cst_106 : f32 to vector<16x8x128xf32>
    %513 = vector.broadcast %cst_107 : f32 to vector<16x8x128xf32>
    %514 = arith.select %495, %512, %513 : vector<16x8x128xi1>, vector<16x8x128xf32>
    %cst_108 = arith.constant 1.000000e+00 : f32
    %515 = vector.broadcast %cst_108 : f32 to vector<16x8x128xf32>
    %516 = arith.subf %515, %511 : vector<16x8x128xf32>
    %517 = arith.mulf %516, %516 : vector<16x8x128xf32>
    %518 = arith.mulf %514, %517 : vector<16x8x128xf32>
    %519 = math.log %511 : vector<16x8x128xf32>
    %cst_109 = arith.constant 0.000000e+00 : f32
    %520 = vector.broadcast %cst_109 : f32 to vector<16x8x128xf32>
    %521 = arith.subf %520, %519 : vector<16x8x128xf32>
    %522 = arith.mulf %518, %521 : vector<16x8x128xf32>
    %cst_110 = arith.constant 0.000000e+00 : f32
    %523 = vector.broadcast %cst_110 : f32 to vector<16x8x128xf32>
    %524 = arith.select %501, %522, %523 : vector<16x8x128xi1>, vector<16x8x128xf32>
    %c0_111 = arith.constant 0 : index
    %c0_112 = arith.constant 0 : index
    %525 = vector.load %arg12[%c0_111, %c0_112] : memref<8x128xf32, #tpu.memory_space<vmem>>, vector<8x128xf32>
    %cst_113 = arith.constant dense<0.000000e+00> : vector<8x128xf32>
    %526 = vector.multi_reduction <add>, %524, %cst_113 [0] : vector<16x8x128xf32> to vector<8x128xf32>
    %527 = arith.addf %525, %526 : vector<8x128xf32>
    %c0_114 = arith.constant 0 : index
    %c0_115 = arith.constant 0 : index
    %528 = vector.load %arg12[%c0_114, %c0_115] : memref<8x128xf32, #tpu.memory_space<vmem>>, vector<8x128xf32>
    tpu.vector_store %arg12[%c0_114, %c0_115], %527 {strides = array<i32>} : memref<8x128xf32, #tpu.memory_space<vmem>>, vector<8x128xf32>,
    %529 = arith.andi %487, %485 : vector<8x128xi1>
    %530 = arith.extui %529 : vector<8x128xi1> to vector<8x128xi32>
    %531 = arith.sitofp %530 : vector<8x128xi32> to vector<8x128xf32>
    %532 = arith.subf %21, %17 : vector<8x128xf32>
    %533 = arith.subf %23, %19 : vector<8x128xf32>
    %cst_116 = arith.constant 5.000000e-01 : f32
    %534 = vector.broadcast %cst_116 : f32 to vector<8x128xf32>
    %535 = arith.mulf %534, %532 : vector<8x128xf32>
    %536 = arith.addf %17, %535 : vector<8x128xf32>
    %cst_117 = arith.constant 5.000000e-01 : f32
    %537 = vector.broadcast %cst_117 : f32 to vector<8x128xf32>
    %538 = arith.mulf %537, %533 : vector<8x128xf32>
    %539 = arith.addf %19, %538 : vector<8x128xf32>
    %cst_118 = arith.constant 1.000000e+00 : f32
    %540 = vector.broadcast %cst_118 : f32 to vector<8x128xf32>
    %541 = arith.select %529, %532, %540 : vector<8x128xi1>, vector<8x128xf32>
    %cst_119 = arith.constant 1.000000e+00 : f32
    %542 = vector.broadcast %cst_119 : f32 to vector<8x128xf32>
    %543 = arith.select %529, %533, %542 : vector<8x128xi1>, vector<8x128xf32>
    %544 = arith.subf %474, %470 : vector<8x128xf32>
    %cst_120 = arith.constant 1.000000e+00 : f32
    %545 = vector.broadcast %cst_120 : f32 to vector<8x128xf32>
    %546 = arith.select %529, %544, %545 : vector<8x128xi1>, vector<8x128xf32>
    %547 = arith.subf %476, %472 : vector<8x128xf32>
    %cst_121 = arith.constant 1.000000e+00 : f32
    %548 = vector.broadcast %cst_121 : f32 to vector<8x128xf32>
    %549 = arith.select %529, %547, %548 : vector<8x128xi1>, vector<8x128xf32>
    %550 = arith.subf %474, %470 : vector<8x128xf32>
    %cst_122 = arith.constant 5.000000e-01 : f32
    %551 = vector.broadcast %cst_122 : f32 to vector<8x128xf32>
    %552 = arith.mulf %551, %550 : vector<8x128xf32>
    %553 = arith.addf %470, %552 : vector<8x128xf32>
    %554 = arith.select %529, %553, %536 : vector<8x128xi1>, vector<8x128xf32>
    %555 = arith.subf %476, %472 : vector<8x128xf32>
    %cst_123 = arith.constant 5.000000e-01 : f32
    %556 = vector.broadcast %cst_123 : f32 to vector<8x128xf32>
    %557 = arith.mulf %556, %555 : vector<8x128xf32>
    %558 = arith.addf %472, %557 : vector<8x128xf32>
    %559 = arith.select %529, %558, %539 : vector<8x128xi1>, vector<8x128xf32>
    %cst_124 = arith.constant 1.000000e+00 : f32
    %560 = vector.broadcast %cst_124 : f32 to vector<8x128xf32>
    %561 = arith.divf %560, %541 : vector<8x128xf32>
    %cst_125 = arith.constant 1.000000e+00 : f32
    %562 = vector.broadcast %cst_125 : f32 to vector<8x128xf32>
    %563 = arith.divf %562, %543 : vector<8x128xf32>
    %564 = arith.subf %554, %536 : vector<8x128xf32>
    %565 = arith.mulf %564, %561 : vector<8x128xf32>
    %566 = arith.subf %559, %539 : vector<8x128xf32>
    %567 = arith.mulf %566, %563 : vector<8x128xf32>
    %568 = arith.mulf %546, %561 : vector<8x128xf32>
    %569 = math.log %568 : vector<8x128xf32>
    %570 = arith.mulf %549, %563 : vector<8x128xf32>
    %571 = math.log %570 : vector<8x128xf32>
    %c0_126 = arith.constant 0 : index
    %572 = arith.index_cast %12 : i32 to index
    %c0_127 = arith.constant 0 : index
    %c0_128 = arith.constant 0 : index
    %c0_129 = arith.constant 0 : index
    %573 = vector.load %arg7[%c0_126, %572, %c0_127, %c0_128, %c0_129] : memref<1x1x4x8x128xf32, #tpu.memory_space<vmem>>, vector<1x1x4x8x128xf32>
    %574 = vector.shape_cast %573 : vector<1x1x4x8x128xf32> to vector<4x8x128xf32>
    %c0_130 = arith.constant 0 : index
    %c0_131 = arith.constant 0 : index
    %575 = vector.load %arg13[%c0_130, %c0_131] : memref<8x128xf32, #tpu.memory_space<vmem>>, vector<8x128xf32>
    %576 = vector.extract_strided_slice %574 {offsets = [0, 0, 0], sizes = [1, 8, 128], strides = [1, 1, 1]} : vector<4x8x128xf32> to vector<1x8x128xf32>
    %577 = vector.shape_cast %576 : vector<1x8x128xf32> to vector<8x128xf32>
    %578 = arith.subf %577, %565 : vector<8x128xf32>
    %579 = math.absf %578 : vector<8x128xf32>
    %cst_132 = arith.constant 0.111111112 : f32
    %580 = vector.broadcast %cst_132 : f32 to vector<8x128xf32>
    %581 = arith.cmpf olt, %579, %580 : vector<8x128xf32>
    %cst_133 = arith.constant 4.500000e+00 : f32
    %582 = vector.broadcast %cst_133 : f32 to vector<8x128xf32>
    %583 = arith.mulf %582, %579 : vector<8x128xf32>
    %584 = arith.mulf %583, %579 : vector<8x128xf32>
    %cst_134 = arith.constant 0.055555556 : f32
    %585 = vector.broadcast %cst_134 : f32 to vector<8x128xf32>
    %586 = arith.subf %579, %585 : vector<8x128xf32>
    %587 = arith.select %581, %584, %586 : vector<8x128xi1>, vector<8x128xf32>
    %588 = vector.extract_strided_slice %574 {offsets = [1, 0, 0], sizes = [1, 8, 128], strides = [1, 1, 1]} : vector<4x8x128xf32> to vector<1x8x128xf32>
    %589 = vector.shape_cast %588 : vector<1x8x128xf32> to vector<8x128xf32>
    %590 = arith.subf %589, %567 : vector<8x128xf32>
    %591 = math.absf %590 : vector<8x128xf32>
    %cst_135 = arith.constant 0.111111112 : f32
    %592 = vector.broadcast %cst_135 : f32 to vector<8x128xf32>
    %593 = arith.cmpf olt, %591, %592 : vector<8x128xf32>
    %cst_136 = arith.constant 4.500000e+00 : f32
    %594 = vector.broadcast %cst_136 : f32 to vector<8x128xf32>
    %595 = arith.mulf %594, %591 : vector<8x128xf32>
    %596 = arith.mulf %595, %591 : vector<8x128xf32>
    %cst_137 = arith.constant 0.055555556 : f32
    %597 = vector.broadcast %cst_137 : f32 to vector<8x128xf32>
    %598 = arith.subf %591, %597 : vector<8x128xf32>
    %599 = arith.select %593, %596, %598 : vector<8x128xi1>, vector<8x128xf32>
    %600 = arith.addf %587, %599 : vector<8x128xf32>
    %601 = vector.extract_strided_slice %574 {offsets = [2, 0, 0], sizes = [1, 8, 128], strides = [1, 1, 1]} : vector<4x8x128xf32> to vector<1x8x128xf32>
    %602 = vector.shape_cast %601 : vector<1x8x128xf32> to vector<8x128xf32>
    %603 = arith.subf %602, %569 : vector<8x128xf32>
    %604 = math.absf %603 : vector<8x128xf32>
    %cst_138 = arith.constant 0.111111112 : f32
    %605 = vector.broadcast %cst_138 : f32 to vector<8x128xf32>
    %606 = arith.cmpf olt, %604, %605 : vector<8x128xf32>
    %cst_139 = arith.constant 4.500000e+00 : f32
    %607 = vector.broadcast %cst_139 : f32 to vector<8x128xf32>
    %608 = arith.mulf %607, %604 : vector<8x128xf32>
    %609 = arith.mulf %608, %604 : vector<8x128xf32>
    %cst_140 = arith.constant 0.055555556 : f32
    %610 = vector.broadcast %cst_140 : f32 to vector<8x128xf32>
    %611 = arith.subf %604, %610 : vector<8x128xf32>
    %612 = arith.select %606, %609, %611 : vector<8x128xi1>, vector<8x128xf32>
    %613 = arith.addf %600, %612 : vector<8x128xf32>
    %614 = vector.extract_strided_slice %574 {offsets = [3, 0, 0], sizes = [1, 8, 128], strides = [1, 1, 1]} : vector<4x8x128xf32> to vector<1x8x128xf32>
    %615 = vector.shape_cast %614 : vector<1x8x128xf32> to vector<8x128xf32>
    %616 = arith.subf %615, %571 : vector<8x128xf32>
    %617 = math.absf %616 : vector<8x128xf32>
    %cst_141 = arith.constant 0.111111112 : f32
    %618 = vector.broadcast %cst_141 : f32 to vector<8x128xf32>
    %619 = arith.cmpf olt, %617, %618 : vector<8x128xf32>
    %cst_142 = arith.constant 4.500000e+00 : f32
    %620 = vector.broadcast %cst_142 : f32 to vector<8x128xf32>
    %621 = arith.mulf %620, %617 : vector<8x128xf32>
    %622 = arith.mulf %621, %617 : vector<8x128xf32>
    %cst_143 = arith.constant 0.055555556 : f32
    %623 = vector.broadcast %cst_143 : f32 to vector<8x128xf32>
    %624 = arith.subf %617, %623 : vector<8x128xf32>
    %625 = arith.select %619, %622, %624 : vector<8x128xi1>, vector<8x128xf32>
    %626 = arith.addf %613, %625 : vector<8x128xf32>
    %627 = arith.mulf %626, %531 : vector<8x128xf32>
    %628 = arith.addf %575, %627 : vector<8x128xf32>
    %c0_144 = arith.constant 0 : index
    %c0_145 = arith.constant 0 : index
    %629 = vector.load %arg13[%c0_144, %c0_145] : memref<8x128xf32, #tpu.memory_space<vmem>>, vector<8x128xf32>
    tpu.vector_store %arg13[%c0_144, %c0_145], %628 {strides = array<i32>} : memref<8x128xf32, #tpu.memory_space<vmem>>, vector<8x128xf32>,
    %c0_146 = arith.constant 0 : index
    %c0_147 = arith.constant 0 : index
    %630 = vector.load %arg14[%c0_146, %c0_147] : memref<8x128xf32, #tpu.memory_space<vmem>>, vector<8x128xf32>
    %631 = arith.addf %630, %531 : vector<8x128xf32>
    %c0_148 = arith.constant 0 : index
    %c0_149 = arith.constant 0 : index
    %632 = vector.load %arg14[%c0_148, %c0_149] : memref<8x128xf32, #tpu.memory_space<vmem>>, vector<8x128xf32>
    tpu.vector_store %arg14[%c0_148, %c0_149], %631 {strides = array<i32>} : memref<8x128xf32, #tpu.memory_space<vmem>>, vector<8x128xf32>,
    %c1_i32_150 = arith.constant 1 : i32
    %c0_i32_151 = arith.constant 0 : i32
    %633 = arith.cmpi eq, %arg2, %c0_i32_151 : i32
    %634 = arith.extui %633 : i1 to i32
    %c0_i32_152 = arith.constant 0 : i32
    %635 = arith.cmpi ne, %634, %c0_i32_152 : i32
    scf.if %635 {
      %c0_153 = arith.constant 0 : index
      %c0_154 = arith.constant 0 : index
      %636 = vector.load %arg12[%c0_153, %c0_154] : memref<8x128xf32, #tpu.memory_space<vmem>>, vector<8x128xf32>
      %c0_155 = arith.constant 0 : index
      %c0_156 = arith.constant 0 : index
      %c0_157 = arith.constant 0 : index
      %c0_158 = arith.constant 0 : index
      %637 = vector.load %arg9[%c0_155, %c0_156, %c0_157, %c0_158] : memref<1x1x8x128xf32, #tpu.memory_space<vmem>>, vector<1x1x8x128xf32>
      %638 = vector.shape_cast %637 : vector<1x1x8x128xf32> to vector<8x128xf32>
      %639 = vector.shape_cast %636 : vector<8x128xf32> to vector<1x1x8x128xf32>
      tpu.vector_store %arg9[%c0_155, %c0_156, %c0_157, %c0_158], %639 {strides = array<i32>} : memref<1x1x8x128xf32, #tpu.memory_space<vmem>>, vector<1x1x8x128xf32>,
      %c0_159 = arith.constant 0 : index
      %c0_160 = arith.constant 0 : index
      %640 = vector.load %arg13[%c0_159, %c0_160] : memref<8x128xf32, #tpu.memory_space<vmem>>, vector<8x128xf32>
      %c0_161 = arith.constant 0 : index
      %c0_162 = arith.constant 0 : index
      %c0_163 = arith.constant 0 : index
      %c0_164 = arith.constant 0 : index
      %641 = vector.load %arg10[%c0_161, %c0_162, %c0_163, %c0_164] : memref<1x1x8x128xf32, #tpu.memory_space<vmem>>, vector<1x1x8x128xf32>
      %642 = vector.shape_cast %641 : vector<1x1x8x128xf32> to vector<8x128xf32>
      %643 = vector.shape_cast %640 : vector<8x128xf32> to vector<1x1x8x128xf32>
      tpu.vector_store %arg10[%c0_161, %c0_162, %c0_163, %c0_164], %643 {strides = array<i32>} : memref<1x1x8x128xf32, #tpu.memory_space<vmem>>, vector<1x1x8x128xf32>,
      %c0_165 = arith.constant 0 : index
      %c0_166 = arith.constant 0 : index
      %644 = vector.load %arg14[%c0_165, %c0_166] : memref<8x128xf32, #tpu.memory_space<vmem>>, vector<8x128xf32>
      %c0_167 = arith.constant 0 : index
      %c0_168 = arith.constant 0 : index
      %c0_169 = arith.constant 0 : index
      %c0_170 = arith.constant 0 : index
      %645 = vector.load %arg11[%c0_167, %c0_168, %c0_169, %c0_170] : memref<1x1x8x128xf32, #tpu.memory_space<vmem>>, vector<1x1x8x128xf32>
      %646 = vector.shape_cast %645 : vector<1x1x8x128xf32> to vector<8x128xf32>
      %647 = vector.shape_cast %644 : vector<8x128xf32> to vector<1x1x8x128xf32>
      tpu.vector_store %arg11[%c0_167, %c0_168, %c0_169, %c0_170], %647 {strides = array<i32>} : memref<1x1x8x128xf32, #tpu.memory_space<vmem>>, vector<1x1x8x128xf32>,
    } else {
    }
    return
  }
  func.func @transform_0(%arg0: i32, %arg1: i32, %arg2: i32) -> i32 {
    %c0_i32 = arith.constant 0 : i32
    %c0_i32_0 = arith.constant 0 : i32
    return %c0_i32 : i32
  }
  func.func @transform_1(%arg0: i32, %arg1: i32, %arg2: i32) -> i32 {
    %c0_i32 = arith.constant 0 : i32
    %c0_i32_0 = arith.constant 0 : i32
    return %c0_i32 : i32
  }
  func.func @transform_2(%arg0: i32, %arg1: i32, %arg2: i32) -> i32 {
    %c0_i32 = arith.constant 0 : i32
    %c0_i32_0 = arith.constant 0 : i32
    return %c0_i32 : i32
  }
  func.func @transform_3(%arg0: i32, %arg1: i32, %arg2: i32) -> (i32, i32, i32, i32, i32) {
    %c1_i32 = arith.constant 1 : i32
    %0 = arith.muli %arg1, %c1_i32 : i32
    %1 = arith.addi %0, %arg2 : i32
    %c0_i32 = arith.constant 0 : i32
    %c0_i32_0 = arith.constant 0 : i32
    %c0_i32_1 = arith.constant 0 : i32
    %c0_i32_2 = arith.constant 0 : i32
    return %arg0, %1, %c0_i32, %c0_i32_0, %c0_i32_1 : i32, i32, i32, i32, i32
  }
  func.func @transform_4(%arg0: i32, %arg1: i32, %arg2: i32) -> (i32, i32, i32, i32, i32) {
    %c1_i32 = arith.constant 1 : i32
    %0 = arith.muli %arg1, %c1_i32 : i32
    %1 = arith.addi %0, %arg2 : i32
    %c0_i32 = arith.constant 0 : i32
    %c0_i32_0 = arith.constant 0 : i32
    %c0_i32_1 = arith.constant 0 : i32
    %c0_i32_2 = arith.constant 0 : i32
    return %arg0, %1, %c0_i32, %c0_i32_0, %c0_i32_1 : i32, i32, i32, i32, i32
  }
  func.func @transform_5(%arg0: i32, %arg1: i32, %arg2: i32) -> (i32, i32, i32, i32) {
    %c1_i32 = arith.constant 1 : i32
    %0 = arith.muli %arg1, %c1_i32 : i32
    %1 = arith.addi %0, %arg2 : i32
    %c0_i32 = arith.constant 0 : i32
    %c0_i32_0 = arith.constant 0 : i32
    %c0_i32_1 = arith.constant 0 : i32
    %c0_i32_2 = arith.constant 0 : i32
    return %1, %c0_i32, %c0_i32_0, %c0_i32_1 : i32, i32, i32, i32
  }
  func.func @transform_6(%arg0: i32, %arg1: i32, %arg2: i32) -> (i32, i32, i32, i32) {
    %c0_i32 = arith.constant 0 : i32
    %c0_i32_0 = arith.constant 0 : i32
    %c0_i32_1 = arith.constant 0 : i32
    return %arg0, %arg1, %c0_i32, %c0_i32_0 : i32, i32, i32, i32
  }
  func.func @transform_7(%arg0: i32, %arg1: i32, %arg2: i32) -> (i32, i32, i32, i32) {
    %c0_i32 = arith.constant 0 : i32
    %c0_i32_0 = arith.constant 0 : i32
    %c0_i32_1 = arith.constant 0 : i32
    return %arg0, %arg1, %c0_i32, %c0_i32_0 : i32, i32, i32, i32
  }
  func.func @transform_8(%arg0: i32, %arg1: i32, %arg2: i32) -> (i32, i32, i32, i32) {
    %c0_i32 = arith.constant 0 : i32
    %c0_i32_0 = arith.constant 0 : i32
    %c0_i32_1 = arith.constant 0 : i32
    return %arg0, %arg1, %c0_i32, %c0_i32_0 : i32, i32, i32, i32
  }
}

</mosaic_0001>

<bundles_post_ra>
// kernel: tpu_custom_call.1
= control target key start
LH: loop header
LB: loop body
LE: loop exit
PB: predicated region body
PF: predicated region fallthrough
CT: control target
= control target key end

     0   :  { %s3862_s0 = inlined_call_operand.hbm [shape: s32[2], index: 0, kind: input, shape index: {}]   ;;  %s3863_s1 = inlined_call_operand.vmem [shape: f32[64], index: 1, kind: input, shape index: {}]   ;;  %s3864_s2 = inlined_call_operand.vmem [shape: s32[16], index: 2, kind: input, shape index: {}]   ;;  %s3865_s3 = inlined_call_operand.hbm [shape: f32[2,1,16,8,128], index: 3, kind: input, shape index: {}]   ;;  %s3866_s4 = inlined_call_operand.hbm [shape: f32[2,1,4,8,128], index: 4, kind: input, shape index: {}]   ;;  %s3867_s5 = inlined_call_operand.hbm [shape: f32[1,4,8,128], index: 5, kind: input, shape index: {}]   ;;  %s3868_s6 = inlined_call_operand.hbm [shape: f32[2,1,8,128], index: 6, kind: output, shape index: {0}]   ;;  %s3869_s7 = inlined_call_operand.hbm [shape: f32[2,1,8,128], index: 7, kind: output, shape index: {1}]   ;;  %s3870_s8 = inlined_call_operand.hbm [shape: f32[2,1,8,128], index: 8, kind: output, shape index: {2}]  }
   0x1   :  { %3916 = sst [smem:[#allocation50_spill]] %s3862_s0 }
   0x2   :  { %3917 = sst [smem:[#allocation51_spill]] %s3863_s1 }
   0x3   :  { %3918 = sst [smem:[#allocation52_spill]] %s3864_s2 }
   0x4   :  { %3919 = sst [smem:[#allocation53_spill]] %s3865_s3 }
   0x5   :  { %3920 = sst [smem:[#allocation54_spill]] %s3866_s4 }
   0x6   :  { %3921 = sst [smem:[#allocation55_spill]] %s3867_s5 }
   0x7   :  { %3922 = sst [smem:[#allocation56_spill]] %s3868_s6 }
   0x8   :  { %3923 = sst [smem:[#allocation57_spill]] %s3869_s7 }
   0x9   :  { %3924 = sst [smem:[#allocation58_spill]] %s3870_s8 }
   0xa   :  { %14 = vsyncpa [#allocation8], 0 }
   0xb   :  { %15 = vsyncpa [#allocation9], 0 }
   0xc   :  { %16 = vsyncpa [#allocation12], 0 }
   0xd   :  { %17 = vsyncpa [#allocation6], 0 }
   0xe   :  { %19 = vsyncpa [#allocation6 + $0x1], 0 }
   0xf   :  { %20 = vsyncpa [#allocation15], 0 }
  0x10   :  { %22 = vsyncpa [#allocation15 + $0x1], 0 }
  0x11   :  { %23 = vsyncpa [#allocation7], 0 }
  0x12   :  { %25 = vsyncpa [#allocation7 + $0x1], 0 }
  0x13   :  { %26 = vsyncpa [#allocation19], 0 }
  0x14   :  { %28 = vsyncpa [#allocation19 + $0x1], 0  ;;  %s2124_s27 = smov 0   ;;  %s2126_s28 = smov 0  }
  0x15   :  { %s2128_s29 = smov 0   ;;  %s2130_s30 = smov 0  }
  0x16   :  { %s2132_s9 = smov 0   ;;  %s2134_s10 = smov 0  }
  0x17 LB: > { %3925 = sst [smem:[#allocation29_spill]] %s2044_s27  ;;  %s2155_s11 = sadd.s32 4294967295, %s2064_s10   ;;  %s2064_s10 = sphi %s2134_s10, %s34_s10   ;;  %s2060_s9 = sphi %s2132_s9, %s4155_s9   ;;  %s2056_s30 = sphi %s2130_s30, %s4154_s30   ;;  %s2052_s29 = sphi %s2128_s29, %s4153_s29   ;;  %s2048_s28 = sphi %s2126_s28, %s4152_s28   ;;  %s2044_s27 = sphi %s2124_s27, %s4151_s27  }
  0x18   : > { %3926 = sst [smem:[#allocation30_spill]] %s2048_s28  ;;  %s3871_s12 = sadd.s32 4294967294, %s2064_s10  }
  0x19   : > { %3927 = sst [smem:[#allocation31_spill]] %s2052_s29  ;;  %p140_p0 = scmp.ne.s32.totalorder %s2048_s28, %s2044_s27 }
  0x1a   : > { %3928 = sst [smem:[#allocation32_spill]] %s2060_s9  ;;  %p3873_p1 = scmp.eq.s32.totalorder %s2155_s11, 0 }
  0x1b   : > { %3929 = sst [smem:[#allocation33_spill]] %s2064_s10  ;;  %p230_p3 = scmp.eq.s32.totalorder %s3871_s12, 1 }
  0x1c   : > { %3930 = sst [smem:[#allocation34_spill]] %s2155_s11  ;;  %p2166_p4 = por %p3873_p1, %p140_p0 }
  0x1d   : > { %p1540_p5 = scmp.ge.s32.totalorder %s2064_s10, 1  ;;  %p2171_p6 = por %p230_p3, %p140_p0 }
  0x1e   : > { %s3931_s13 = scalar_select %p2166_p4, 1, 0 }
  0x1f   : > { %s3932_s14 = scalar_select %p2171_p6, 1, 0 }
  0x20   : > { %p293_p7 = scmp.lt.s32.totalorder %s2064_s10, 3  ;;  %s2066_s16 = smov [#allocation16]  }
  0x21   : > { %3933 = sst [smem:[#allocation35_spill]] %s3932_s14  ;;  %s340_s17 = sshll.u32 %s2066_s16, 4  ;;  %s341_s17 = int_to_ptr.vmem [resolvable:$true] %s340_s17 }
  0x22   : > { %p2176_p8 = pnand %p1540_p5, %p293_p7  ;;  %s3936_s1 = sld [smem:[#allocation51_spill]] }
  0x23   : > { %s1796_s22 = scalar_lea.vmem %s341_s17, 512  ;;  %p1804_p5 = scmp.lt.s32.totalorder %s341_s17, %s341_s17 }
  0x24   : > { %s3934_s15 = scalar_select %p2176_p8, 1, 0 }
  0x25   : > { %p1633_p9 = pneg %p2176_p8  ;;  %p1797_p13 = scmp.ne.s32.totalorder %s341_s17, %s1796_s22 }
  0x26   : > { %p1805_p7 = scmp.lt.s32.totalorder %s1796_s22, %s1796_s22 }
  0x27   : > { %p2185_p11 = pnand %p1633_p9, %p3873_p1 }
  0x28   : > { %s315_s21 = sshll.u32 %s3936_s1, 4  ;;  %p1806_p9 = por %p1805_p7, %p1804_p5  ;;  %s316_s21 = int_to_ptr.vmem [resolvable:$true] %s315_s21 }
  0x29   : > { %p1787_p12 = pneg %p2185_p11 }
  0x2b   : > { %p1799_p0 = pnand %p1797_p13, %p1787_p12 }
  0x2d   : > { %p1800_p3 = pneg %p1799_p0 }
  0x2f   : > { %p1807_p10 = pnand %p1806_p9, %p1800_p3 }
  0x31   : > { %1810 = shalt.err (!%p1807_p10)
}
  0x32   : > { %s3876_s23 = smov 128   ;;  %s3878_s24 = smov 8  }
  0x33   : > { %s3937_s5 = sld [smem:[#allocation55_spill]]  ;;  %s2069_s16 = smov [#allocation5]  }
  0x34   : > { %s3938_s0 = sld [smem:[#allocation50_spill]]  ;;  %s1822_s14 = scalar_lea.vmem %s316_s21, 16 }
  0x35   : > { %s3939_s2 = sld [smem:[#allocation52_spill]]  ;;  %p1823_p10 = scmp.ne.s32.totalorder %s316_s21, %s1822_s14 }
  0x36   : > { %p1830_p3 = scmp.lt.s32.totalorder %s316_s21, %s316_s21  ;;  %p1831_p5 = scmp.lt.s32.totalorder %s1822_s14, %s1822_s14 }
  0x37   : > { %p1825_p13 = pnand %p1823_p10, %p1787_p12 }
  0x38   : > { %p1832_p7 = por %p1831_p5, %p1830_p3 }
  0x39   : > { %1645 = dma.hbm_to_vmem [thread:$0]  (!%p2185_p11), %s3937_s5, 512, %s341_s17, [#allocation15], %s3876_s23, %s3876_s23, %s3878_s24  }
  0x3a   : > { %1636 = dma.hbm_to_smem (!%p2185_p11), %s3938_s0, 16, %s2069_s16, [#allocation8]  }
  0x3b   : > { %s326_s1 = sshll.u32 %s3939_s2, 4  ;;  %p1826_p0 = pneg %p1825_p13  ;;  %s327_s1 = int_to_ptr.vmem [resolvable:$true] %s326_s1 }
  0x3d   : > { %p1833_p9 = pnand %p1832_p7, %p1826_p0 }
  0x3f   : > { %1836 = shalt.err (!%p1833_p9)
}
  0x40   : > { %s2070_s17 = smov [#allocation10]   ;;  %s1837_s25 = scalar_lea.vmem %s327_s1, 16 }
  0x41   : > { %1639 = dma.vmem_to_smem (!%p2185_p11), %s316_s21, 16, %s2070_s17, [#allocation9]  }
  0x42   : > { %p1838_p1 = scmp.ne.s32.totalorder %s327_s1, %s1837_s25  ;;  %p1845_p4 = scmp.lt.s32.totalorder %s327_s1, %s327_s1 }
  0x43   : > { %p1846_p10 = scmp.lt.s32.totalorder %s1837_s25, %s1837_s25 }
  0x44   : > { %p1840_p2 = pnand %p1838_p1, %p1787_p12 }
  0x45   : > { %p1847_p13 = por %p1846_p10, %p1845_p4 }
  0x46   : > { %p1841_p6 = pneg %p1840_p2 }
  0x48   : > { %p1848_p8 = pnand %p1847_p13, %p1841_p6 }
  0x4a   : > { %1851 = shalt.err (!%p1848_p8)
}
  0x4b   : > { %s2071_s12 = smov [#allocation11]   ;;  %s53_s14 = sadd.s32 1, %s2060_s9 }
  0x4c   : > { %1642 = dma.vmem_to_smem (!%p2185_p11), %s327_s1, 16, %s2071_s12, [#allocation12]  }
  0x4d   : > { %s127_s21 = sadd.s32 1, %s2052_s29  ;;  %p55_p1 = scmp.ge.s32.totalorder %s53_s14, 2 }
  0x4e   : > { %p134_p2 = scmp.ne.s32.totalorder %s2052_s29, %s2048_s28  ;;  %p135_p4 = scmp.eq.s32.totalorder %s2064_s10, 0 }
  0x4f   : > { %p1667_p6 = scmp.lt.s32.totalorder %s2064_s10, 2  ;;  %s4157_s14 = smov (%p55_p1, %s53_s14), 0 }
  0x50   : > { %3940 = sst [smem:[#allocation36_spill]] %s4157_s14  ;;  %p136_p8 = por %p135_p4, %p134_p2 }
  0x51   : > { %p3941_p12 = scmp.eq.s32.totalorder %s2155_s11, 1  ;;  %s122_s26 = ssub.s32 %s2060_s9, %s4157_s14 }
  0x52   : > { %s2240_s16 = sand.u32 1, %s2052_s29   ;;  %p125_p11 = scmp.eq.s32.totalorder %s122_s26, 0 }
  0x53   : > { %p2233_p0 = por %p3941_p12, %p134_p2  ;;  %s1546_s1 = sshll.u32 %s2240_s16, 7 }
  0x54   : > { %s1584_s19 = sshll.u32 %s2060_s9, 11  ;;  %s3945_s3 = sld [smem:[#allocation53_spill]] }
  0x55   : > { %s3942_s18 = scalar_select %p2233_p0, 1, 0 }
  0x56   : > { %s2245_s20 = scalar_select %p125_p11, %s2052_s29, %s127_s21  }
  0x57   : > { %3943 = sst [smem:[#allocation37_spill]] %s3942_s18  ;;  %s358_s12 = scalar_lea.vmem [#allocation13], %s1546_s1 }
  0x58   : > { %3944 = sst [smem:[#allocation38_spill]] %s2245_s20  ;;  %s368_s23 = sshll.u32 %s358_s12, 4  ;;  %s369_s23 = int_to_ptr.vmem [resolvable:$true] %s368_s23 }
  0x59   : > { %p2252_p3 = pnand %p1667_p6, %p136_p8  ;;  %s378_s0 = sand.u32 1, %s2064_s10  }
  0x5a   : > { %s367_s25 = scalar_lea.hbm %s3945_s3, %s1584_s19  ;;  %s355_s26 = scalar_lea.sflag [#allocation6], %s2240_s16 }
  0x5b   : > { %p1854_p5 = pneg %p2252_p3  ;;  %s1865_s21 = scalar_lea.vmem %s369_s23, 2048 }
  0x5c   : > { %p1866_p7 = scmp.ne.s32.totalorder %s369_s23, %s1865_s21  ;;  %s2072_s1 = smov [#allocation13]  }
  0x5d   : > { %s1870_s19 = sshll.u32 %s2072_s1, 4  ;;  %s1871_s19 = int_to_ptr.vmem [resolvable:$false] %s1870_s19 }
  0x5e   : > { %p1868_p9 = pnand %p1866_p7, %p1854_p5  ;;  %s1872_s22 = scalar_lea.vmem %s1871_s19, 4096 }
  0x5f   : > { %p1873_p13 = scmp.lt.s32.totalorder %s369_s23, %s1871_s19  ;;  %p1874_p1 = scmp.lt.s32.totalorder %s1872_s22, %s1865_s21 }
  0x60   : > { %p1869_p10 = pneg %p1868_p9 }
  0x61   : > { %p1875_p2 = por %p1874_p1, %p1873_p13 }
  0x63   : > { %p1876_p4 = pnand %p1875_p2, %p1869_p10 }
  0x65   : > { %1879 = shalt.err (!%p1876_p4)
}
  0x66   : > { %s3947_s17 = smov 8   ;;  %s3948_s12 = smov 128  }
  0x67   : > { %1649 = dma.hbm_to_vmem [thread:$0]  (!%p2252_p3), %s367_s25, 2048, %s369_s23, %s355_s26, %s3948_s12, %s3948_s12, %s3947_s17  }
  0x68   : > { %s1549_s2 = sshll.u32 %s2240_s16, 5  ;;  %s1585_s3 = sshll.u32 %s2060_s9, 9 }
  0x69   : > { %s3949_s4 = sld [smem:[#allocation54_spill]]  ;;  %s382_s19 = scalar_lea.vmem [#allocation14], %s1549_s2 }
  0x6a   : > { %s392_s21 = sshll.u32 %s382_s19, 4  ;;  %s379_s22 = scalar_lea.sflag [#allocation15], %s378_s0  ;;  %s393_s21 = int_to_ptr.vmem [resolvable:$true] %s392_s21 }
  0x6b   : > { %s1893_s20 = scalar_lea.vmem %s393_s21, 512  ;;  %s2073_s29 = smov [#allocation14]  }
  0x6c   : > { %p1894_p6 = scmp.ne.s32.totalorder %s393_s21, %s1893_s20  ;;  %s1898_s10 = sshll.u32 %s2073_s29, 4  ;;  %s1899_s10 = int_to_ptr.vmem [resolvable:$false] %s1898_s10 }
  0x6d   : > { %s1900_s23 = scalar_lea.vmem %s1899_s10, 1024  ;;  %p1901_p11 = scmp.lt.s32.totalorder %s393_s21, %s1899_s10 }
  0x6e   : > { %p1896_p8 = pnand %p1894_p6, %p1854_p5  ;;  %p1902_p7 = scmp.lt.s32.totalorder %s1900_s23, %s1893_s20 }
  0x6f   : > { %s391_s14 = scalar_lea.hbm %s3949_s4, %s1585_s3 }
  0x70   : > { %p1897_p12 = pneg %p1896_p8  ;;  %p1903_p9 = por %p1902_p7, %p1901_p11 }
  0x72   : > { %p1904_p10 = pnand %p1903_p9, %p1897_p12 }
  0x74   : > { %1907 = shalt.err (!%p1904_p10)
}
  0x75   : > { %1652 = dma.hbm_to_vmem [thread:$0]  (!%p2252_p3), %s391_s14, 512, %s393_s21, %s379_s22, %s3948_s12, %s3948_s12, %s3947_s17  }
  0x76   : > { %p3950_p13 = scmp.ne.s32.totalorder %s3934_s15, 0 }
  0x78   : > { %404 = sbr.rel (%p3950_p13) target bundleno = 400 (0x190), region = 44 }
  0x7d   : > { %p3951_p5 = scmp.eq.s32.totalorder %s2155_s11, 0 }
  0x7f   : > { %2011 = dma.done.wait (%p3951_p5), [#allocation8], 16   ;;  %p3952_p1 = pmov %p3951_p5 }
  0x81   : > { %2013 = vsyncadd (%p3952_p1), [#allocation8], 4294967280  ;;  %p3953_p2 = pmov %p3952_p1 }
  0x82   : > { %p3954_p4 = pmov %p3952_p1 }
  0x83   : > { %2015 = dma.done.wait (%p3953_p2), [#allocation9], 16  }
  0x84   : > { %2017 = vsyncadd (%p3954_p4), [#allocation9], 4294967280  ;;  %p3955_p6 = pmov %p3952_p1 }
  0x85   : > { %p3956_p3 = pmov %p3952_p1 }
  0x86   : > { %2019 = dma.done.wait (%p3955_p6), [#allocation12], 16  }
  0x87   : > { %2021 = vsyncadd (%p3956_p3), [#allocation12], 4294967280  ;;  %s2296_s0 = sand.u32 1, %s2048_s28   ;;  %p3959_p8 = scmp.ne.s32.totalorder %s3931_s13, 0 }
  0x88   : > { %3957 = sst [smem:[#allocation39_spill]] %s2296_s0  ;;  %s1556_s2 = sshll.u32 %s2296_s0, 7 }
  0x89   : > { %s419_s3 = scalar_lea.sflag [#allocation6], %s2296_s0  ;;  %s2300_s5 = scalar_lea.vmem [#allocation13], %s1556_s2 }
  0x8a   : > { %3958 = sst [smem:[#allocation40_spill]] %s2300_s5 }
  0x8b   : > { %2023 = dma.done.wait (%p3959_p8), %s419_s3, 2048  }
  0x8c   : > { %2025 = vsyncadd (%p3959_p8), %s419_s3, 4294965248  ;;  %s3884_s29 = sand.u32 1, %s2155_s11   ;;  %s1557_s10 = sshll.u32 %s2296_s0, 5 }
  0x8d   : > { %s428_s15 = scalar_lea.sflag [#allocation15], %s3884_s29  ;;  %s2310_s24 = scalar_lea.vmem [#allocation14], %s1557_s10 }
  0x8e   : > { %3960 = sst [smem:[#allocation41_spill]] %s2310_s24 }
  0x8f   : > { %2027 = dma.done.wait (%p3959_p8), %s428_s15, 512  }
  0x90   : > { %2029 = vsyncadd (%p3959_p8), %s428_s15, 4294966784  ;;  %p3961_p12 = pmov %p3952_p1 }
  0x91   : > { %p3962_p11 = pmov %p3952_p1 }
  0x92   : > { %2031 = dma.done.wait (%p3961_p12), [#allocation15], 512  }
  0x93   : > { %2033 = vsyncadd (%p3962_p11), [#allocation15], 4294966784 }
  0x94   : > { %440 = sfence }
  0x95   : > { %s2321_s14 = sld [smem:[#allocation5 + %s2056_s30]]  ;;  %s2324_s16 = sshll.u32 %s2056_s30, 5  ;;  %v2341_v0 = vld [vmem:[#allocation16] sm:$0xff]  ;;  %v2347_v1 = vld [vmem:[#allocation16 + $0x8] sm:$0xff]  ;;  %v2349_v2 = vld [vmem:[#allocation16 + $0x10] sm:$0xff] }
  0x96   : > { %s2327_s13 = sld [smem:[#allocation10 + %s2324_s16]]  ;;  %s509_s20 = sadd.s32 1, %s2324_s16  ;;  %v2351_v3 = vld [vmem:[#allocation16 + $0x18] sm:$0xff]  ;;  %v2357_v4 = vsub.f32 %v2349_v2, %v2341_v0 }
  0x97   : > { %s2330_s25 = sld [smem:[#allocation10 + %s509_s20]]  ;;  %s511_s26 = sadd.s32 2, %s2324_s16  ;;  %v2361_v5 = vsub.f32 %v2351_v3, %v2347_v1 }
  0x98   : > { %s2333_s17 = sld [smem:[#allocation10 + %s511_s26]]  ;;  %s513_s12 = sadd.s32 3, %s2324_s16 }
  0x99   : > { %s2336_s1 = sld [smem:[#allocation10 + %s513_s12]]  ;;  %s2339_s19 = sadd.s32 4, %s2324_s16  ;;  %v2391_v13 = vmul.f32 %v2361_v5, %v2357_v4 }
  0x9a   : > { %s2345_s21 = sld [smem:[#allocation10 + %s2339_s19]]  ;;  %s554_s22 = sadd.s32 1, %s2339_s19 }
  0x9b   : > { %p539_p7 = scmp.gt.s32.totalorder %s2321_s14, 0  ;;  %s556_s23 = sadd.s32 2, %s2339_s19 }
  0x9c   : > { %v519_v6 = vstv %s2327_s13  ;;  %s2370_s3 = sld [smem:[#allocation10 + %s554_s22]]  ;;  %s558_s10 = sadd.s32 3, %s2339_s19 }
  0x9d   : > { %s2364_s2 = scalar_select %p539_p7, 1, 0  ;;  %v520_v7 = vmax.f32 %v2341_v0, %v519_v6  ;;  %v525_v8 = vstv %s2330_s25 }
  0x9e   : > { %v517_v9 = vstv %s2333_s17  ;;  %v526_v10 = vmax.f32 %v2347_v1, %v525_v8  ;;  %s530_s15 = ssub.f32 %s2333_s17, %s2327_s13  ;;  %p583_p9 = scmp.gt.s32.totalorder %s2321_s14, 1 }
  0x9f   : > { %v518_v11 = vmin.f32 %v2349_v2, %v517_v9  ;;  %v523_v12 = vstv %s2336_s1  ;;  %s531_s20 = ssub.f32 %s2336_s1, %s2330_s25  ;;  %s2387_s26 = sadd.s32 8, %s2324_s16  ;;  %v541_v59 = vstv %s2364_s2 }
  0xa0   : > { %v524_v14 = vmin.f32 %v2351_v3, %v523_v12  ;;  %s2396_s12 = sld [smem:[#allocation10 + %s556_s23]]  ;;  %s598_s19 = sadd.s32 1, %s2387_s26  ;;  %v563_v17 = vstv %s2345_s21  ;;  %vm2538_vm0 = vcmp.eq.s32.totalorder %v541_v59, 1 }
  0xa1   : > { %v521_v15 = vsub.f32 %v518_v11, %v520_v7  ;;  %s532_s22 = smul.f32 %s531_s20, %s530_s15  ;;  %s2399_s29 = sld [smem:[#allocation10 + %s558_s10]]  ;;  %v564_v23 = vmax.f32 %v2341_v0, %v563_v17 }
  0xa2   : > { %v527_v16 = vsub.f32 %v524_v14, %v526_v10  ;;  %s2404_s4 = scalar_select %p583_p9, 1, 0  ;;  %v569_v20 = vstv %s2370_s3 }
  0xa3   : > { %v522_v18 = vmax.f32 %v521_v15, 0.0  ;;  %v533_v19 = vstv %s532_s22  ;;  %s2408_s23 = sld [smem:[#allocation10 + %s2387_s26]]  ;;  %s600_s10 = sadd.s32 2, %s2387_s26  ;;  %v570_v26 = vmax.f32 %v2347_v1, %v569_v20 }
  0xa4   : > { %v528_v21 = vmax.f32 %v527_v16, 0.0  ;;  %v534_v22 = vadd.f32 %v533_v19, %v2391_v13  ;;  %s2412_s15 = sld [smem:[#allocation10 + %s598_s19]]  ;;  %s602_s20 = sadd.s32 3, %s2387_s26 }
  0xa5   : > { %s2418_s9 = sld [smem:[#allocation10 + %s600_s10]]  ;;  %p627_p10 = scmp.gt.s32.totalorder %s2321_s14, 2 }
  0xa6   : > { %v2421_v24 = vmul.f32 %v528_v21, %v522_v18  ;;  %v561_v25 = vstv %s2396_s12  ;;  %s574_s22 = ssub.f32 %s2396_s12, %s2345_s21  ;;  %s2430_s28 = sadd.s32 12, %s2324_s16 }
  0xa7   : > { %v562_v27 = vmin.f32 %v2349_v2, %v561_v25  ;;  %v567_v28 = vstv %s2399_s29  ;;  %s575_s26 = ssub.f32 %s2399_s29, %s2370_s3  ;;  %s642_s19 = sadd.s32 1, %s2430_s28 }
  0xa8   : > { %v535_v29 = vsub.f32 %v534_v22, %v2421_v24  ;;  %v568_v30 = vmin.f32 %v2351_v3, %v567_v28  ;;  %s2443_s10 = sld [smem:[#allocation10 + %s602_s20]]  ;;  %s644_s27 = sadd.s32 2, %s2430_s28 }
  0xa9   : > { %v565_v31 = vsub.f32 %v562_v27, %v564_v23  ;;  %s576_s6 = smul.f32 %s575_s26, %s574_s22  ;;  %v607_v32 = vstv %s2408_s23  ;;  %s2448_s18 = sld [smem:[#allocation10 + %s2430_s28]] }
  0xaa   : > { %1729 = vrcp.f32 %v535_v29  ;;  %v571_v33 = vsub.f32 %v568_v30, %v570_v26  ;;  %v608_v34 = vmax.f32 %v2341_v0, %v607_v32  ;;  %v613_v35 = vstv %s2412_s15  ;;  %s2456_s8 = scalar_select %p627_p10, 1, 0 }
  0xab   : > { %v566_v36 = vmax.f32 %v565_v31, 0.0  ;;  %v577_v37 = vstv %s576_s6  ;;  %v605_v38 = vstv %s2418_s9  ;;  %s618_s20 = ssub.f32 %s2418_s9, %s2408_s23  ;;  %s646_s22 = sadd.s32 3, %s2430_s28  ;;  %v614_v42 = vmax.f32 %v2347_v1, %v613_v35 }
  0xac   : > { %v572_v39 = vmax.f32 %v571_v33, 0.0  ;;  %v578_v40 = vadd.f32 %v577_v37, %v2391_v13  ;;  %v606_v41 = vmin.f32 %v2349_v2, %v605_v38  ;;  %s2466_s26 = sld [smem:[#allocation10 + %s642_s19]]  ;;  %p671_p13 = scmp.gt.s32.totalorder %s2321_s14, 3  ;;  %v585_v30 = vstv %s2404_s4 }
  0xad   : > { %s2472_s11 = sld [smem:[#allocation10 + %s644_s27]]  ;;  %s2475_s6 = sadd.s32 16, %s2324_s16  ;;  %vm2589_vm3 = vcmp.eq.s32.totalorder %v585_v30, 1 }
  0xae   : > { %3963 = sst [smem:[#allocation42_spill]] %s2443_s10  ;;  %v2477_v43 = vmul.f32 %v572_v39, %v566_v36  ;;  %v609_v44 = vsub.f32 %v606_v41, %v608_v34  ;;  %v611_v45 = vstv %s2443_s10  ;;  %s686_s19 = sadd.s32 1, %s2475_s6 }
  0xaf   : > { %3964 = sst [smem:[#allocation43_spill]] %s2448_s18  ;;  %v612_v46 = vmin.f32 %v2351_v3, %v611_v45  ;;  %v651_v47 = vstv %s2448_s18  ;;  %s688_s27 = sadd.s32 2, %s2475_s6 }
  0xb0   : > { %s619_s28 = ssub.f32 %s2443_s10, %s2412_s15  ;;  %v579_v48 = vsub.f32 %v578_v40, %v2477_v43  ;;  %v610_v49 = vmax.f32 %v609_v44, 0.0  ;;  %v652_v52 = vmax.f32 %v2341_v0, %v651_v47  ;;  %s690_s0 = sadd.s32 3, %s2475_s6 }
  0xb1   : > { %s2486_s7 = sld [smem:[#allocation10 + %s646_s22]]  ;;  %v615_v50 = vsub.f32 %v612_v46, %v614_v42  ;;  %s2518_s10 = sadd.s32 20, %s2324_s16 }
  0xb2   : > { %3965 = sst [smem:[#allocation44_spill]] %s2466_s26  ;;  %s620_s24 = smul.f32 %s619_s28, %s618_s20  ;;  %1731 = vrcp.f32 %v579_v48  ;;  %v657_v53 = vstv %s2466_s26 }
  0xb3   : > { %3966 = sst [smem:[#allocation45_spill]] %s2472_s11  ;;  %v616_v54 = vmax.f32 %v615_v50, 0.0  ;;  %v649_v56 = vstv %s2472_s11  ;;  %v658_v58 = vmax.f32 %v2347_v1, %v657_v53  ;;  %p715_p5 = scmp.gt.s32.totalorder %s2321_s14, 4 }
  0xb4   : > { %s2492_s5 = sld [smem:[#allocation10 + %s2475_s6]]  ;;  %v621_v51 = vstv %s620_s24  ;;  %v650_v57 = vmin.f32 %v2349_v2, %v649_v56  ;;  %p759_p1 = scmp.gt.s32.totalorder %s2321_s14, 5 }
  0xb5   : > { %s2496_s22 = scalar_select %p671_p13, 1, 0  ;;  %v622_v55 = vadd.f32 %v621_v51, %v2391_v13  ;;  %v2521_v60 = vmul.f32 %v616_v54, %v610_v49 }
  0xb6   : > { %s2502_s20 = sld [smem:[#allocation10 + %s686_s19]]  ;;  %v653_v62 = vsub.f32 %v650_v57, %v652_v52  ;;  %p803_p2 = scmp.gt.s32.totalorder %s2321_s14, 6 }
  0xb7   : > { %3967 = sst [smem:[#allocation46_spill]] %s2486_s7  ;;  %v655_v61 = vstv %s2486_s7  ;;  %v1730_v10 = vpop.eup %1729  ;;  %v623_v11 = vsub.f32 %v622_v55, %v2521_v60  ;;  %s2771_s25 = sshll.u32 %s2056_s30, 3 }
  0xb8   : > { %s662_s28 = ssub.f32 %s2472_s11, %s2448_s18  ;;  %v656_v63 = vmin.f32 %v2351_v3, %v655_v61  ;;  %v537_v14 = vmul.f32 %v1730_v10, %v2421_v24  ;;  %v654_v19 = vmax.f32 %v653_v62, 0.0  ;;  %s2560_s18 = sadd.s32 24, %s2324_s16 }
  0xb9   : > { %s2515_s24 = sld [smem:[#allocation10 + %s688_s27]]  ;;  %s730_s27 = sadd.s32 1, %s2518_s10  ;;  %1733 = vrcp.f32 %v623_v11 }
  0xba   : > { %s663_s19 = ssub.f32 %s2486_s7, %s2466_s26  ;;  %v695_v7 = vstv %s2492_s5  ;;  %v659_v16 = vsub.f32 %v656_v63, %v658_v58  ;;  %vm538_vm1 = vcmp.gt.f32.partialorder %v537_v14, -1.0  ;;  %s734_s7 = sadd.s32 3, %s2518_s10  ;;  %v629_v58 = vstv %s2456_s8 }
  0xbb   : > { %s2529_s6 = sld [smem:[#allocation10 + %s690_s0]]  ;;  %v696_v18 = vmax.f32 %v2341_v0, %v695_v7  ;;  %s732_s0 = sadd.s32 2, %s2518_s10  ;;  %vm2564_vm2 = vmand %vm538_vm1, %vm2538_vm0  ;;  %vm2641_vm6 = vcmp.eq.s32.totalorder %v629_v58, 1 }
  0xbc   : > { %s664_s2 = smul.f32 %s663_s19, %s662_s28  ;;  %s2535_s11 = sld [smem:[#allocation10 + %s2518_s10]]  ;;  %v701_v22 = vstv %s2502_s20  ;;  %v660_v23 = vmax.f32 %v659_v16, 0.0  ;;  %v544_v41 = vsel %vm2564_vm2, %v537_v14, -1.0 }
  0xbd   : > { %s2547_s28 = sld [smem:[#allocation10 + %s730_s27]]  ;;  %v702_v31 = vmax.f32 %v2347_v1, %v701_v22  ;;  %p847_p4 = scmp.gt.s32.totalorder %s2321_s14, 7 }
  0xbe   : > { %v665_v21 = vstv %s664_s2  ;;  %s2557_s26 = sld [smem:[#allocation10 + %s732_s0]]  ;;  %v2574_v33 = vmul.f32 %v660_v23, %v654_v19  ;;  %s774_s2 = sadd.s32 1, %s2560_s18 }
  0xbf   : > { %v693_v24 = vstv %s2515_s24  ;;  %s706_s19 = ssub.f32 %s2515_s24, %s2492_s5  ;;  %v666_v26 = vadd.f32 %v665_v21, %v2391_v13  ;;  %v1732_v40 = vpop.eup %1731  ;;  %s595_s15 = sadd.s32 2, %s2771_s25 }
  0xc0   : > { %v694_v27 = vmin.f32 %v2349_v2, %v693_v24  ;;  %s2577_s27 = sld [smem:[#allocation10 + %s734_s7]]  ;;  %s776_s7 = sadd.s32 2, %s2560_s18  ;;  %v581_v46 = vmul.f32 %v1732_v40, %v2477_v43 }
  0xc1   : > { %3968 = sst [smem:[#allocation47_spill]] %s2529_s6  ;;  %v699_v36 = vstv %s2529_s6  ;;  %v667_v44 = vsub.f32 %v666_v26, %v2574_v33  ;;  %s683_s24 = sadd.s32 4, %s2771_s25 }
  0xc2   : > { %s707_s10 = ssub.f32 %s2529_s6, %s2502_s20  ;;  %v697_v34 = vsub.f32 %v694_v27, %v696_v18  ;;  %v700_v37 = vmin.f32 %v2351_v3, %v699_v36  ;;  %v739_v39 = vstv %s2535_s11  ;;  %s778_s6 = sadd.s32 3, %s2560_s18  ;;  %vm582_vm4 = vcmp.gt.f32.partialorder %v581_v46, %v544_v41 }
  0xc3   : > { %s2585_s4 = sld [smem:[#allocation10 + %s2560_s18]]  ;;  %v745_v50 = vstv %s2547_s28  ;;  %1735 = vrcp.f32 %v667_v44  ;;  %v740_v54 = vmax.f32 %v2341_v0, %v739_v39  ;;  %vm2616_vm5 = vmand %vm582_vm4, %vm2589_vm3 }
  0xc4   : > { %3971 = sst [smem:[#allocation48_spill]] %s2557_s26  ;;  %s708_s0 = smul.f32 %s707_s10, %s706_s19  ;;  %v703_v48 = vsub.f32 %v700_v37, %v702_v31  ;;  %v698_v51 = vmax.f32 %v697_v34, 0.0  ;;  %v737_v52 = vstv %s2557_s26  ;;  %v746_v63 = vmax.f32 %v2347_v1, %v745_v50 }
  0xc5   : > { %s2597_s19 = sld [smem:[#allocation10 + %s774_s2]]  ;;  %v738_v55 = vmin.f32 %v2349_v2, %v737_v52  ;;  %s2612_s2 = sadd.s32 28, %s2324_s16  ;;  %v588_v16 = vsel %vm2616_vm5, %v581_v46, %v544_v41 }
  0xc6   : > { %3974 = sst [smem:[#allocation49_spill]] %s2577_s27  ;;  %v709_v49 = vstv %s708_s0  ;;  %v704_v43 = vmax.f32 %v703_v48, 0.0  ;;  %v743_v62 = vstv %s2577_s27  ;;  %v1734_v15 = vpop.eup %1733 }
  0xc7   : > { %s750_s10 = ssub.f32 %s2557_s26, %s2535_s11  ;;  %v710_v59 = vadd.f32 %v709_v49, %v2391_v13  ;;  %v741_v11 = vsub.f32 %v738_v55, %v740_v54  ;;  %v744_v14 = vmin.f32 %v2351_v3, %v743_v62  ;;  %v625_v21 = vmul.f32 %v1734_v15, %v2521_v60 }
  0xc8   : > { %s2609_s0 = sld [smem:[#allocation10 + %s776_s7]]  ;;  %s818_s7 = sadd.s32 1, %s2612_s2  ;;  %v2631_v10 = vmul.f32 %v704_v43, %v698_v51  ;;  %v673_v60 = vstv %s2496_s22 }
  0xc9   : > { %s751_s18 = ssub.f32 %s2577_s27, %s2547_s28  ;;  %v783_v19 = vstv %s2585_s4  ;;  %v747_v26 = vsub.f32 %v744_v14, %v746_v63  ;;  %v742_v30 = vmax.f32 %v741_v11, 0.0  ;;  %s822_s27 = sadd.s32 3, %s2612_s2  ;;  %vm626_vm7 = vcmp.gt.f32.partialorder %v625_v21, %v588_v16 }
  0xca   : > { %s2628_s16 = sld [smem:[#allocation10 + %s778_s6]]  ;;  %s820_s6 = sadd.s32 2, %s2612_s2  ;;  %v711_v23 = vsub.f32 %v710_v59, %v2631_v10  ;;  %v784_v37 = vmax.f32 %v2341_v0, %v783_v19  ;;  %vm2664_vm8 = vmand %vm626_vm7, %vm2641_vm6  ;;  %vm2688_vm9 = vcmp.eq.s32.totalorder %v673_v60, 1 }
  0xcb   : > { %s752_s8 = smul.f32 %s751_s18, %s750_s10  ;;  %s2637_s26 = sld [smem:[#allocation10 + %s2612_s2]]  ;;  %v789_v27 = vstv %s2597_s19  ;;  %v748_v40 = vmax.f32 %v747_v26, 0.0  ;;  %v632_v43 = vsel %vm2664_vm8, %v625_v21, %v588_v16 }
  0xcc   : > { %s2650_s10 = sld [smem:[#allocation10 + %s818_s7]]  ;;  %1737 = vrcp.f32 %v711_v23  ;;  %v790_v48 = vmax.f32 %v2347_v1, %v789_v27  ;;  %s727_s28 = sadd.s32 5, %s2771_s25 }
  0xcd   : > { %v753_v31 = vstv %s752_s8  ;;  %s2660_s7 = sld [smem:[#allocation10 + %s820_s6]]  ;;  %v2681_v49 = vmul.f32 %v748_v40, %v742_v30 }
  0xce   : > { %v781_v34 = vstv %s2609_s0  ;;  %s794_s18 = ssub.f32 %s2609_s0, %s2585_s4  ;;  %v754_v42 = vadd.f32 %v753_v31, %v2391_v13  ;;  %s771_s0 = sadd.s32 6, %s2771_s25 }
  0xcf   : > { %v782_v44 = vmin.f32 %v2349_v2, %v781_v34  ;;  %s2678_s2 = sld [smem:[#allocation10 + %s822_s27]] }
  0xd0   : > { %v787_v46 = vstv %s2628_s16  ;;  %s795_s22 = ssub.f32 %s2628_s16, %s2597_s19  ;;  %v1736_v63 = vpop.eup %1735  ;;  %v755_v11 = vsub.f32 %v754_v42, %v2681_v49  ;;  %s815_s16 = sadd.s32 7, %s2771_s25 }
  0xd1   : > { %v785_v51 = vsub.f32 %v782_v44, %v784_v37  ;;  %v788_v54 = vmin.f32 %v2351_v3, %v787_v46  ;;  %v827_v58 = vstv %s2637_s26  ;;  %v669_v16 = vmul.f32 %v1736_v63, %v2574_v33  ;;  %s716_s6 = scalar_select %p715_p5, 1, 0 }
  0xd2   : > { %s796_s8 = smul.f32 %s795_s22, %s794_s18  ;;  %v833_v59 = vstv %s2650_s10  ;;  %v828_v26 = vmax.f32 %v2341_v0, %v827_v58  ;;  %1739 = vrcp.f32 %v755_v11  ;;  %s2796_s12 = sld [smem:[#allocation11 + %s2771_s25]] }
  0xd3   : > { %v786_v14 = vmax.f32 %v785_v51, 0.0  ;;  %v791_v15 = vsub.f32 %v788_v54, %v790_v48  ;;  %v825_v23 = vstv %s2660_s7  ;;  %s838_s27 = ssub.f32 %s2660_s7, %s2637_s26  ;;  %v834_v37 = vmax.f32 %v2347_v1, %v833_v59 }
  0xd4   : > { %v797_v18 = vstv %s796_s8  ;;  %v826_v31 = vmin.f32 %v2349_v2, %v825_v23  ;;  %vm670_vm10 = vcmp.gt.f32.partialorder %v669_v16, %v632_v43  ;;  %v717_v48 = vstv %s716_s6  ;;  %s760_s8 = scalar_select %p759_p1, 1, 0 }
  0xd5   : > { %v798_v21 = vadd.f32 %v797_v18, %v2391_v13  ;;  %v792_v30 = vmax.f32 %v791_v15, 0.0  ;;  %v831_v33 = vstv %s2678_s2  ;;  %s839_s18 = ssub.f32 %s2678_s2, %s2650_s10  ;;  %vm2719_vm11 = vmand %vm670_vm10, %vm2688_vm9  ;;  %vm718_vm12 = vcmp.eq.s32.totalorder %v717_v48, 1 }
  0xd6   : > { %v829_v40 = vsub.f32 %v826_v31, %v828_v26  ;;  %v832_v42 = vmin.f32 %v2351_v3, %v831_v33  ;;  %v676_v55 = vsel %vm2719_vm11, %v669_v16, %v632_v43  ;;  %v547_v43 = vsel %vm2564_vm2, %v519_v6, %v2341_v0  ;;  %s804_s21 = scalar_select %p803_p2, 1, 0 }
  0xd7   : > { %v793_v60 = vmul.f32 %v792_v30, %v786_v14  ;;  %s840_s22 = smul.f32 %s839_s18, %s838_s27  ;;  %v550_v16 = vsel %vm2564_vm2, %v523_v12, %v2351_v3  ;;  %v761_v30 = vstv %s760_s8  ;;  %v496_v31 = vlaneseq  ;;  %s551_s27 = sadd.s32 1, %s2771_s25 }
  0xd8   : > { %v830_v54 = vmax.f32 %v829_v40, 0.0  ;;  %v835_v63 = vsub.f32 %v832_v42, %v834_v37  ;;  %vm762_vm15 = vcmp.eq.s32.totalorder %v761_v30, 1  ;;  %s2819_s23 = sld [smem:[#allocation11 + %s551_s27]]  ;;  %s639_s8 = sadd.s32 3, %s2771_s25 }
  0xd9   : > { %v799_v51 = vsub.f32 %v798_v21, %v793_v60  ;;  %v841_v11 = vstv %s840_s22  ;;  %v1738_v14 = vpop.eup %1737  ;;  %s848_s6 = scalar_select %p847_p4, 1, 0 }
  0xda   : > { %v836_v15 = vmax.f32 %v835_v63, 0.0  ;;  %v842_v18 = vadd.f32 %v841_v11, %v2391_v13  ;;  %v713_v26 = vmul.f32 %v1738_v14, %v2631_v10  ;;  %v548_v13 = vsel %vm2564_vm2, %v525_v8, %v2347_v1  ;;  %s2842_s22 = sld [smem:[#allocation11 + %s595_s15]]  ;;  %s3404_s25 = sshll.u32 %s2056_s30, 7 }
  0xdb   : > { %1741 = vrcp.f32 %v799_v51  ;;  %v549_v10 = vsel %vm2564_vm2, %v517_v9, %v2349_v2  ;;  %v591_v2 = vsel %vm2616_vm5, %v563_v17, %v547_v43  ;;  %v592_v9 = vsel %vm2616_vm5, %v569_v20, %v548_v13  ;;  %s4001_s5 = sld [smem:[#allocation39_spill]] }
  0xdc   : > { %v2730_v21 = vmul.f32 %v836_v15, %v830_v54  ;;  %vm714_vm13 = vcmp.gt.f32.partialorder %v713_v26, %v676_v55  ;;  %v593_v3 = vsel %vm2616_vm5, %v561_v25, %v549_v10  ;;  %v594_v17 = vsel %vm2616_vm5, %v567_v28, %v550_v16  ;;  %s2866_s20 = sld [smem:[#allocation11 + %s639_s8]] }
  0xdd   : > { %vm2753_vm14 = vmand %vm714_vm13, %vm718_vm12  ;;  %v635_v37 = vsel %vm2664_vm8, %v607_v32, %v591_v2  ;;  %v636_v28 = vsel %vm2664_vm8, %v613_v35, %v592_v9  ;;  %v637_v40 = vsel %vm2664_vm8, %v605_v38, %v593_v3  ;;  %v497_v32 = vshrl.u32 %v496_v31, 7  ;;  %s2893_s11 = sld [smem:[#allocation11 + %s683_s24]]  ;;  %s2076_s24 = smov [#allocation18]  }
  0xde   : > { %v843_v8 = vsub.f32 %v842_v18, %v2730_v21  ;;  %v720_v20 = vsel %vm2753_vm14, %v713_v26, %v676_v55  ;;  %v805_v35 = vstv %s804_s21  ;;  %v679_v38 = vsel %vm2719_vm11, %v651_v47, %v635_v37  ;;  %s4002_s4 = sld [smem:[#allocation40_spill]] }
  0xdf   : > { %v1740_v12 = vpop.eup %1739  ;;  %v680_v48 = vsel %vm2719_vm11, %v657_v53, %v636_v28  ;;  %v499_v53 = vand.u32 127, %v496_v31  ;;  %vm806_vm3 = vcmp.eq.s32.totalorder %v805_v35, 1  ;;  %v723_v63 = vsel %vm2753_vm14, %v695_v7, %v679_v38  ;;  %s2927_s19 = sld [smem:[#allocation11 + %s727_s28]] }
  0xe0   : > { %1743 = vrcp.f32 %v843_v8  ;;  %v757_v25 = vmul.f32 %v1740_v12, %v2681_v49  ;;  %v638_v49 = vsel %vm2664_vm8, %v611_v45, %v594_v17  ;;  %v681_v45 = vsel %vm2719_vm11, %v649_v56, %v637_v40  ;;  %s2969_s26 = sld [smem:[#allocation11 + %s771_s0]] }
  0xe1   : > { %v682_v54 = vsel %vm2719_vm11, %v655_v61, %v638_v49  ;;  %v724_v61 = vsel %vm2753_vm14, %v701_v22, %v680_v48  ;;  %v725_v11 = vsel %vm2753_vm14, %v693_v24, %v681_v45  ;;  %v860_v14 = vmul.u32 128, %v497_v32  ;;  %s2897_s13 = sshll.u32 %s4001_s5, 3  ;;  %s2990_s7 = sld [smem:[#allocation11 + %s815_s16]] }
  0xe2   : > { %vm758_vm0 = vcmp.gt.f32.partialorder %v757_v25, %v720_v20  ;;  %v849_v22 = vstv %s848_s6  ;;  %v545_v55 = vstv %s2796_s12  ;;  %v589_v13 = vstv %s2819_s23  ;;  %s483_s10 = scalar_lea.vmem [#allocation20], %s2897_s13  ;;  %s4007_s2 = sld [smem:[#allocation41_spill]] }
  0xe3   : > { %vm2803_vm1 = vmand %vm758_vm0, %vm762_vm15  ;;  %v2875_v43 = vadd.s32 %v860_v14, %v499_v53  ;;  %vm850_vm7 = vcmp.eq.s32.totalorder %v849_v22, 1  ;;  %v1184_v2 = vmul.f32 0.5, %v2361_v5  ;;  %v677_v31 = vstv %s2866_s20  ;;  %s476_s17 = scalar_lea.vmem [#allocation18], %s2897_s13  ;;  %s1316_s30 = sshll.u32 %s483_s10, 4  ;;  %s3472_s30 = int_to_ptr.vmem [resolvable:$true] %s1316_s30 }
  0xe4   : > { %v764_v47 = vsel %vm2803_vm1, %v757_v25, %v720_v20  ;;  %v767_v24 = vsel %vm2803_vm1, %v739_v39, %v723_v63  ;;  %v768_v15 = vsel %vm2803_vm1, %v745_v50, %v724_v61  ;;  %v938_v9 = vld [vmem:[%s4002_s4 + $0x8] sm:$0xff]  ;;  %v939_v17 = vld [vmem:[%s4002_s4 + $0x10] sm:$0xff]  ;;  %v940_v20 = vld [vmem:[%s4002_s4 + $0x18] sm:$0xff]  ;;  %v2074_v37 = vmov 0.0   ;;  %s1302_s1 = sshll.u32 %s476_s17, 4  ;;  %s4061_s29 = sld [smem:[#allocation57_spill]]  ;;  %s3450_s1 = int_to_ptr.vmem [resolvable:$true] %s1302_s1 }
  0xe5   : > { %vm3906_vm10 = vcmp.lt.s32.totalorder %v2875_v43, 576  ;;  %v2957_v25 = vld [vmem:[%s4002_s4 + $0x20] sm:$0xff]  ;;  %v942_v49 = vld [vmem:[%s4002_s4 + $0x28] sm:$0xff]  ;;  %v943_v38 = vld [vmem:[%s4002_s4 + $0x30] sm:$0xff]  ;;  %v721_v45 = vstv %s2893_s11  ;;  %v955_v44 = vmax.f32 %v939_v17, 1e-06 }
  0xe6   : > { %v944_v48 = vld [vmem:[%s4002_s4 + $0x38] sm:$0xff]  ;;  %v949_v63 = vld [vmem:[%s4002_s4 + $0x60] sm:$0xff]  ;;  %v957_v22 = vmax.f32 %v2957_v25, 1e-06  ;;  %v809_v6 = vstv %s2969_s26  ;;  %s4066_s9 = sld [smem:[#allocation34_spill]]  ;;  %s1908_s20 = scalar_lea.vmem %s3450_s1, 128 }
  0xe7   : > { %s4067_s6 = sld [smem:[#allocation58_spill]]  ;;  %p1909_p6 = scmp.ne.s32.totalorder %s3450_s1, %s1908_s20 }
  0xe8   : > { %v1742_v51 = vpop.eup %1741  ;;  %v1212_v17 = vld [vmem:[%s4007_s2] sm:$0xff]  ;;  %s1912_s11 = sshll.u32 %s2076_s24, 4  ;;  %s1913_s11 = int_to_ptr.vmem [resolvable:$false] %s1912_s11 }
  0xe9   : > { %v801_v56 = vmul.f32 %v1742_v51, %v793_v60  ;;  %v726_v60 = vsel %vm2753_vm14, %v699_v36, %v682_v54  ;;  %v769_v36 = vsel %vm2803_vm1, %v737_v52, %v725_v11  ;;  %v546_v52 = vsel %vm2564_vm2, %v545_v55, 0  ;;  %v946_v51 = vld [vmem:[%s4002_s4 + $0x48] sm:$0xff]  ;;  %v947_v54 = vld [vmem:[%s4002_s4 + $0x50] sm:$0xff]  ;;  %p1910_p3 = pnand %p1909_p6, %p2233_p0  ;;  %s1914_s28 = scalar_lea.vmem %s1913_s11, 256 }
  0xea   : > { %v770_v26 = vsel %vm2803_vm1, %v743_v62, %v726_v60  ;;  %v954_v11 = vmax.f32 %v938_v9, 1e-06  ;;  %v956_v60 = vmax.f32 %v940_v20, 1e-06  ;;  %v3022_v20 = vmin.f32 %v957_v22, 0.999999  ;;  %s4062_s12 = smov %s4061_s29  ;;  %s3448_s27 = scalar_lea.hbm %s4061_s29, %s3404_s25 }
  0xeb   : > { %vm802_vm4 = vcmp.gt.f32.partialorder %v801_v56, %v764_v47  ;;  %p1911_p8 = pneg %p1910_p3  ;;  %p1915_p12 = scmp.lt.s32.totalorder %s3450_s1, %s1913_s11 }
  0xec   : > { %vm2849_vm6 = vmand %vm802_vm4, %vm806_vm3  ;;  %v3016_v9 = vmin.f32 %v956_v60, 0.999999  ;;  %p1916_p11 = scmp.lt.s32.totalorder %s1914_s28, %s1908_s20 }
  0xed   : > { %v1744_v18 = vpop.eup %1743  ;;  %v808_v39 = vsel %vm2849_vm6, %v801_v56, %v764_v47  ;;  %v811_v62 = vsel %vm2849_vm6, %v783_v19, %v767_v24  ;;  %v812_v10 = vsel %vm2849_vm6, %v789_v27, %v768_v15  ;;  %v814_v29 = vsel %vm2849_vm6, %v787_v46, %v770_v26  ;;  %v948_v47 = vld [vmem:[%s4002_s4 + $0x58] sm:$0xff]  ;;  %s3470_s18 = scalar_lea.hbm %s4067_s6, %s3404_s25 }
  0xee   : > { %v845_v50 = vmul.f32 %v1744_v18, %v2730_v21  ;;  %v813_v21 = vsel %vm2849_vm6, %v781_v34, %v769_v36  ;;  %v590_v27 = vsel %vm2616_vm5, %v589_v13, %v546_v52  ;;  %v633_v34 = vstv %s2842_s22  ;;  %v950_v36 = vld [vmem:[%s4002_s4 + $0x68] sm:$0xff]  ;;  %v952_v18 = vld [vmem:[%s4002_s4 + $0x78] sm:$0xff]  ;;  %s4069_s22 = sand.u32 1, %s4066_s9   ;;  %p1917_p7 = por %p1916_p11, %p1915_p12 }
  0xef   : > { %v634_v12 = vsel %vm2664_vm8, %v633_v34, %v590_v27  ;;  %v1185_v56 = vadd.f32 %v1184_v2, %v2347_v1  ;;  %v765_v15 = vstv %s2927_s19  ;;  %v958_v1 = vmax.f32 %v942_v49, 1e-06  ;;  %s3489_s8 = scalar_lea.sflag [#allocation19], %s4069_s22 }
  0xf0   : > { %vm846_vm2 = vcmp.gt.f32.partialorder %v845_v50, %v808_v39  ;;  %v959_v26 = vmax.f32 %v943_v38, 1e-06  ;;  %v962_v52 = vmax.f32 %v946_v51, 1e-06  ;;  %v963_v13 = vmax.f32 %v947_v54, 1e-06  ;;  %p1918_p9 = pnand %p1917_p7, %p1911_p8 }
  0xf1   : > { %vm2903_vm9 = vmand %vm846_vm2, %vm850_vm7  ;;  %v966_v34 = vmax.f32 %v950_v36, 1e-06  ;;  %v3024_v25 = vmin.f32 %v958_v1, 0.999999 }
  0xf2   : > { %v2913_v16 = vsel %vm2903_vm9, %v845_v50, %v808_v39  ;;  %v855_v46 = vsel %vm2903_vm9, %v827_v58, %v811_v62  ;;  %v856_v8 = vsel %vm2903_vm9, %v833_v59, %v812_v10  ;;  %v857_v57 = vsel %vm2903_vm9, %v825_v23, %v813_v21  ;;  %v937_v59 = vld [vmem:[%s4002_s4] sm:$0xff] }
  0xf3   : > { %v858_v30 = vsel %vm2903_vm9, %v831_v33, %v814_v29  ;;  %vm865_vm5 = vcmp.ge.f32.partialorder %v2913_v16, 0.5  ;;  %v1182_v58 = vmul.f32 0.5, %v2357_v4  ;;  %v2947_v3 = vsub.f32 %v857_v57, %v855_v46 }
  0xf4   : > { %vm2943_vm12 = vmand %vm865_vm5, %vm3906_vm10  ;;  %v2949_v33 = vsub.f32 %v858_v30, %v856_v8  ;;  %v953_v61 = vmax.f32 %v937_v59, 1e-06  ;;  %v960_v39 = vmax.f32 %v944_v48, 1e-06  ;;  %v964_v62 = vmax.f32 %v948_v47, 1e-06 }
  0xf5   : > { %v2961_v28 = vsel %vm2943_vm12, 1.0, %v2074_v37  ;;  %v1186_v41 = vsel %vm2943_vm12, %v2357_v4, 1.0  ;;  %v1187_v40 = vsel %vm2943_vm12, %v2361_v5, 1.0  ;;  %v1192_v32 = vmul.f32 0.5, %v2947_v3  ;;  %v945_v4 = vld [vmem:[%s4002_s4 + $0x40] sm:$0xff] }
  0xf6   : > { %v1195_v35 = vmul.f32 0.5, %v2949_v33  ;;  %1745 = vrcp.f32 %v1186_v41  ;;  %1262 = vst [vmem:[%s483_s10] sm:$0xff] %v2961_v28  ;;  %v678_v5 = vsel %vm2719_vm11, %v677_v31, %v634_v12  ;;  %v1183_v53 = vadd.f32 %v1182_v58, %v2341_v0  ;;  %v951_v0 = vld [vmem:[%s4002_s4 + $0x70] sm:$0xff] }
  0xf7   : > { %1747 = vrcp.f32 %v1187_v40  ;;  %v1193_v14 = vadd.f32 %v1192_v32, %v855_v46  ;;  %v722_v24 = vsel %vm2753_vm14, %v721_v45, %v678_v5  ;;  %v961_v50 = vmax.f32 %v945_v4, 1e-06  ;;  %v1213_v4 = vld [vmem:[%s4007_s2 + $0x8] sm:$0xff] }
  0xf8   : > { %v1196_v55 = vadd.f32 %v1195_v35, %v856_v8  ;;  %v766_v21 = vsel %vm2803_vm1, %v765_v15, %v722_v24  ;;  %v965_v29 = vmax.f32 %v949_v63, 1e-06  ;;  %v967_v46 = vmax.f32 %v951_v0, 1e-06 }
  0xf9   : > { %v1194_v10 = vsel %vm2943_vm12, %v1193_v14, %v1183_v53  ;;  %v3007_v8 = vmin.f32 %v953_v61, 0.999999  ;;  %v968_v57 = vmax.f32 %v952_v18, 1e-06  ;;  %v3009_v30 = vmin.f32 %v954_v11, 0.999999 }
  0xfa   : > { %v1197_v27 = vsel %vm2943_vm12, %v1196_v55, %v1185_v56  ;;  %v3011_v58 = vmin.f32 %v955_v44, 0.999999  ;;  %v1202_v2 = vsub.f32 %v1194_v10, %v1183_v53  ;;  %v810_v42 = vsel %vm2849_vm6, %v809_v6, %v766_v21 }
  0xfb   : > { %v853_v59 = vstv %s2990_s7  ;;  %v1189_v12 = vsel %vm2943_vm12, %v2947_v3, 1.0  ;;  %v1204_v31 = vsub.f32 %v1197_v27, %v1185_v56  ;;  %v1191_v37 = vsel %vm2943_vm12, %v2949_v33, 1.0 }
  0xfc   : > { %v3029_v7 = vmin.f32 %v959_v26, 0.999999  ;;  %v3031_v41 = vmin.f32 %v960_v39, 0.999999  ;;  %v985_v40 = vsub.f32 1.0, %v3007_v8  ;;  %v3036_v3 = vsel %vm2903_vm9, %v853_v59, %v810_v42 }
  0xfd   : > { %v3038_v32 = vmin.f32 %v961_v50, 0.999999  ;;  %v3040_v35 = vmin.f32 %v962_v52, 0.999999  ;;  %v3042_v38 = vmin.f32 %v963_v13, 0.999999 }
  0xfe   : > { %v3045_v5 = vmin.f32 %v964_v62, 0.999999  ;;  %v3047_v45 = vmin.f32 %v965_v29, 0.999999  ;;  %v3049_v47 = vmin.f32 %v966_v34, 0.999999 }
  0xff   : > { %v3051_v19 = vmin.f32 %v967_v46, 0.999999  ;;  %vm867_vm8 = vcmp.eq.s32.totalorder %v3036_v3, 0  ;;  %v3054_v56 = vmin.f32 %v968_v57, 0.999999  ;;  %vm868_vm11 = vcmp.eq.s32.totalorder %v3036_v3, 1 }
 0x100   : > { %v986_v61 = vsub.f32 1.0, %v3009_v30  ;;  %vm869_vm13 = vcmp.eq.s32.totalorder %v3036_v3, 2  ;;  %v987_v14 = vsub.f32 1.0, %v3011_v58  ;;  %v988_v44 = vsub.f32 1.0, %v3016_v9  ;;  %vm3064_vm15 = vmand %vm865_vm5, %vm867_vm8 }
 0x101   : > { %vm870_vm14 = vcmp.eq.s32.totalorder %v3036_v3, 3  ;;  %v989_v55 = vsub.f32 1.0, %v3022_v20  ;;  %v990_v24 = vsub.f32 1.0, %v3024_v25  ;;  %vm871_vm0 = vcmp.eq.s32.totalorder %v3036_v3, 4  ;;  %vm3073_vm1 = vmand %vm865_vm5, %vm868_vm11 }
 0x102   : > { %v991_v18 = vsub.f32 1.0, %v3029_v7  ;;  %vm872_vm4 = vcmp.eq.s32.totalorder %v3036_v3, 5  ;;  %vm3083_vm6 = vmand %vm865_vm5, %vm869_vm13  ;;  %vm873_vm2 = vcmp.eq.s32.totalorder %v3036_v3, 6  ;;  %v992_v13 = vsub.f32 1.0, %v3031_v41 }
 0x103   : > { %v1746_v49 = vpop.eup %1745  ;;  %vm3092_vm9 = vmand %vm865_vm5, %vm870_vm14  ;;  %vm874_vm12 = vcmp.eq.s32.totalorder %v3036_v3, 7  ;;  %v993_v21 = vsub.f32 1.0, %v3038_v32  ;;  %v994_v6 = vsub.f32 1.0, %v3040_v35  ;;  %v995_v34 = vsub.f32 1.0, %v3042_v38 }
 0x104   : > { %v1748_v48 = vpop.eup %1747  ;;  %v1203_v23 = vmul.f32 %v1746_v49, %v1202_v2  ;;  %v1206_v33 = vmul.f32 %v1746_v49, %v1189_v12  ;;  %vm3102_vm8 = vmand %vm865_vm5, %vm871_vm0  ;;  %v996_v46 = vsub.f32 1.0, %v3045_v5  ;;  %v997_v57 = vsub.f32 1.0, %v3047_v45 }
 0x105   : > { %v1205_v51 = vmul.f32 %v1748_v48, %v1204_v31  ;;  %v1209_v54 = vmul.f32 %v1748_v48, %v1191_v37  ;;  %vm3110_vm11 = vmand %vm865_vm5, %vm872_vm4  ;;  %vm875_vm13 = vcmp.eq.s32.totalorder %v3036_v3, 8  ;;  %v4020_v42 = vmov 0 }
 0x106   : > { %1749 = vlog2.f32 %v1206_v33  ;;  %v1217_v53 = vsub.f32 %v1212_v17, %v1203_v23  ;;  %vm3122_vm14 = vmand %vm865_vm5, %vm873_vm2  ;;  %v998_v59 = vsub.f32 1.0, %v3049_v47  ;;  %v999_v12 = vsub.f32 1.0, %v3051_v19 }
 0x107   : > { %1751 = vlog2.f32 %v1209_v54  ;;  %v1224_v63 = vsub.f32 %v1213_v4, %v1205_v51  ;;  %v4021_v42 = vsel %vm3122_vm14, 4294967295, %v4020_v42  ;;  %vm3136_vm4 = vmand %vm865_vm5, %vm874_vm12  ;;  %v4022_v17 = vmov 0  ;;  %v1214_v54 = vld [vmem:[%s4007_s2 + $0x10] sm:$0xff] }
 0x108   : > { %v1218_v11 = vand.u32 2147483647, %v1217_v53  ;;  %v4023_v17 = vsel %vm3136_vm4, 4294967295, %v4022_v17  ;;  %v1000_v37 = vsub.f32 1.0, %v3054_v56  ;;  %vm879_vm2 = vcmp.eq.s32.totalorder %v3036_v3, 12  ;;  %vm3148_vm14 = vmand %vm865_vm5, %vm875_vm13 }
 0x109   : > { %v1225_v60 = vand.u32 2147483647, %v1224_v63  ;;  %v4024_v49 = vmov 0  ;;  %v3157_v48 = vsel %vm3064_vm15, %v3007_v8, %v985_v40  ;;  %v3162_v23 = vsel %vm3073_vm1, %v3009_v30, %v986_v61  ;;  %v1215_v61 = vld [vmem:[%s4007_s2 + $0x18] sm:$0xff] }
 0x10a   : > { %v1220_v15 = vmul.f32 4.5, %v1218_v11  ;;  %v1572_v36 = vadd.f32 -0.055555556, %v1218_v11  ;;  %vm1219_vm3 = vcmp.lt.f32.partialorder %v1218_v11, 0.11111111  ;;  %v4025_v49 = vsel %vm3148_vm14, 4294967295, %v4024_v49 }
 0x10b   : > { %v1227_v1 = vmul.f32 4.5, %v1225_v60  ;;  %v1573_v26 = vadd.f32 -0.055555556, %v1225_v60  ;;  %vm1226_vm7 = vcmp.lt.f32.partialorder %v1225_v60, 0.11111111  ;;  %v3167_v33 = vsel %vm3083_vm6, %v3011_v58, %v987_v14 }
 0x10c   : > { %v1221_v50 = vmul.f32 %v1220_v15, %v1218_v11  ;;  %v3172_v4 = vsel %vm3092_vm9, %v3016_v9, %v988_v44  ;;  %vm4026_vm12 = vcmp.eq.s32.totalorder %v3036_v3, 9  ;;  %v4027_v8 = vmov 0 }
 0x10d   : > { %v1228_v62 = vmul.f32 %v1227_v1, %v1225_v60  ;;  %vm3179_vm13 = vmand %vm865_vm5, %vm4026_vm12  ;;  %v3186_v30 = vsel %vm3102_vm8, %v3022_v20, %v989_v55  ;;  %v3191_v58 = vsel %vm3110_vm11, %v3024_v25, %v990_v24  ;;  %v3201_v40 = vsel %vm3136_vm4, %v3031_v41, %v992_v13 }
 0x10e   : > { %v1223_v29 = vsel %vm1219_vm3, %v1221_v50, %v1572_v36  ;;  %v4028_v8 = vsel %vm3179_vm13, 4294967295, %v4027_v8  ;;  %vm4029_vm3 = vnez %v4021_v42  ;;  %v3914_v20 = vmov 0.75  }
 0x10f   : > { %v1230_v2 = vsel %vm1226_vm7, %v1228_v62, %v1573_v26  ;;  %vm878_vm7 = vcmp.eq.s32.totalorder %v3036_v3, 11  ;;  %v3196_v9 = vsel %vm4029_vm3, %v3029_v7, %v991_v18  ;;  %v3207_v11 = vsel %vm3064_vm15, 0.25, %v3914_v20 }
 0x110   : > { %v3128_v31 = vadd.f32 %v1230_v2, %v1223_v29  ;;  %v3212_v25 = vsel %vm3073_vm1, 0.25, %v3914_v20  ;;  %v3217_v7 = vsel %vm3083_vm6, 0.25, %v3914_v20  ;;  %vm4030_vm12 = vcmp.eq.s32.totalorder %v3036_v3, 10  ;;  %vm3258_vm10 = vmand %vm865_vm5, %vm878_vm7 }
 0x111   : > { %vm3223_vm0 = vmand %vm865_vm5, %vm4030_vm12  ;;  %v4031_v14 = vmov 0  ;;  %v3230_v44 = vsel %vm3148_vm14, %v3038_v32, %v993_v21  ;;  %v3235_v60 = vsel %vm3092_vm9, 0.25, %v3914_v20  ;;  %v3240_v55 = vsel %vm3102_vm8, 0.25, %v3914_v20 }
 0x112   : > { %v4032_v14 = vsel %vm3223_vm0, 4294967295, %v4031_v14  ;;  %v3246_v15 = vsel %vm3179_vm13, %v3040_v35, %v994_v6  ;;  %v3251_v32 = vsel %vm3110_vm11, 0.25, %v3914_v20  ;;  %1753 = vlog2.f32 %v3157_v48  ;;  %vm3299_vm7 = vmand %vm865_vm5, %vm879_vm2 }
 0x113   : > { %v1750_v51 = vpop.eup %1749  ;;  %v4033_v18 = vmov 0  ;;  %v3265_v35 = vsel %vm4029_vm3, 0.25, %v3914_v20  ;;  %v3270_v1 = vsel %vm3136_vm4, 0.25, %v3914_v20  ;;  %1755 = vlog2.f32 %v3162_v23 }
 0x114   : > { %v1752_v53 = vpop.eup %1751  ;;  %v1208_v63 = vmul.f32 0.6931472, %v1750_v51  ;;  %v4034_v18 = vsel %vm3258_vm10, 4294967295, %v4033_v18  ;;  %v3276_v50 = vsel %vm3223_vm0, %v3042_v38, %v995_v34  ;;  %v3281_v13 = vsel %vm3148_vm14, 0.25, %v3914_v20 }
 0x115   : > { %v1211_v41 = vmul.f32 0.6931472, %v1752_v53  ;;  %1757 = vlog2.f32 %v3167_v33  ;;  %v3287_v21 = vsel %vm3179_vm13, 0.25, %v3914_v20  ;;  %v3292_v6 = vsel %vm3223_vm0, 0.25, %v3914_v20 }
 0x116   : > { %v1232_v24 = vsub.f32 %v1214_v54, %v1208_v63  ;;  %1759 = vlog2.f32 %v3172_v4  ;;  %v3308_v2 = vsel %vm3258_vm10, %v3045_v5, %v996_v46  ;;  %v1033_v51 = vsub.f32 1.0, %v3157_v48 }
 0x117   : > { %v1240_v36 = vsub.f32 %v1215_v61, %v1211_v41  ;;  %vm4037_vm0 = vcmp.eq.s32.totalorder %v3036_v3, 13  ;;  %1761 = vlog2.f32 %v3186_v30  ;;  %vm4040_vm10 = vcmp.eq.s32.totalorder %v3036_v3, 14 }
 0x118   : > { %v1233_v26 = vand.u32 2147483647, %v1232_v24  ;;  %vm3315_vm2 = vmand %vm865_vm5, %vm4037_vm0  ;;  %v1034_v46 = vsub.f32 1.0, %v3162_v23  ;;  %v1035_v48 = vsub.f32 1.0, %v3167_v33  ;;  %vm4043_vm0 = vcmp.eq.s32.totalorder %v3036_v3, 15 }
 0x119   : > { %v1241_v62 = vand.u32 2147483647, %v1240_v36  ;;  %vm3324_vm14 = vmand %vm865_vm5, %vm4040_vm10  ;;  %v3343_v36 = vsel %vm3299_vm7, %v3047_v45, %v997_v57  ;;  %v1036_v23 = vsub.f32 1.0, %v3172_v4  ;;  %1763 = vlog2.f32 %v3191_v58 }
 0x11a   : > { %v1235_v38 = vmul.f32 4.5, %v1233_v26  ;;  %v1574_v29 = vadd.f32 -0.055555556, %v1233_v26  ;;  %vm1234_vm12 = vcmp.lt.f32.partialorder %v1233_v26, 0.11111111  ;;  %vm3334_vm4 = vmand %vm865_vm5, %vm4043_vm0  ;;  %v3352_v33 = vsel %vm3315_vm2, %v3049_v47, %v998_v59 }
 0x11b   : > { %v1243_v54 = vmul.f32 4.5, %v1241_v62  ;;  %v1575_v53 = vadd.f32 -0.055555556, %v1241_v62  ;;  %vm1242_vm13 = vcmp.lt.f32.partialorder %v1241_v62, 0.11111111  ;;  %1765 = vlog2.f32 %v3196_v9 }
 0x11c   : > { %v1236_v61 = vmul.f32 %v1235_v38, %v1233_v26  ;;  %v1037_v26 = vsub.f32 1.0, %v3186_v30  ;;  %vm4046_vm10 = vcmp.lt.f32.partialorder %v2913_v16, 0.4  ;;  %v3370_v47 = vsel %vm3324_vm14, %v3051_v19, %v999_v12 }
 0x11d   : > { %v1244_v41 = vmul.f32 %v1243_v54, %v1241_v62  ;;  %vm3361_vm5 = vmor %vm4046_vm10, %vm3315_vm2  ;;  %v3375_v59 = vsel %vm3315_vm2, 0.25, %v3914_v20  ;;  %v3390_v19 = vsel %vm3334_vm4, %v3054_v56, %v1000_v37  ;;  %v3395_v12 = vsel %vm3324_vm14, 0.25, %v3914_v20 }
 0x11e   : > { %v1238_v3 = vsel %vm1234_vm12, %v1236_v61, %v1574_v29  ;;  %v3400_v38 = vsel %vm3334_vm4, 0.25, %v3914_v20  ;;  %1767 = vlog2.f32 %v3201_v40  ;;  %vm4052_vm2 = vmmov %vm4046_vm10  ;;  %v1038_v37 = vsub.f32 1.0, %v3191_v58 }
 0x11f   : > { %v1239_v45 = vadd.f32 %v1238_v3, %v3128_v31  ;;  %v1246_v57 = vsel %vm1242_vm13, %v1244_v41, %v1575_v53  ;;  %vm4049_vm13 = vmmov %vm4046_vm10  ;;  %v1039_v54 = vsub.f32 1.0, %v3196_v9  ;;  %1769 = vlog2.f32 %v3230_v44  ;;  %v1754_v41 = vpop.eup %1753 }
 0x120   : > { %vm3381_vm12 = vmor %vm4049_vm13, %vm3324_vm14  ;;  %vm4055_vm14 = vcmp.lt.s32.totalorder %v2875_v43, 576  ;;  %v1040_v63 = vsub.f32 1.0, %v3201_v40  ;;  %1771 = vlog2.f32 %v3246_v15  ;;  %v3463_v20 = vmul.f32 0.6931472, %v1754_v41 }
 0x121   : > { %v1247_v29 = vadd.f32 %v1246_v57, %v1239_v45  ;;  %vm3411_vm0 = vmor %vm4052_vm2, %vm3334_vm4  ;;  %1773 = vlog2.f32 %v3352_v33  ;;  %v3475_v31 = vmul.f32 %v1034_v46, %v1034_v46  ;;  %v1047_v45 = vsub.f32 1.0, %v3370_v47 }
 0x122   : > { %vm3424_vm10 = vmand %vm3361_vm5, %vm4055_vm14  ;;  %1775 = vlog2.f32 %v3370_v47  ;;  %v3484_v61 = vmul.f32 %v1035_v48, %v1035_v48 }
 0x123   : > { %v1248_v24 = vmul.f32 %v2961_v28, %v1247_v29  ;;  %vm4058_vm4 = vmmov %vm4055_vm14  ;;  %v1756_v28 = vpop.eup %1755  ;;  %v3461_v29 = vmul.f32 %v1033_v51, %v1033_v51  ;;  %v1046_v51 = vsub.f32 1.0, %v3352_v33  ;;  %1777 = vlog2.f32 %v3390_v19 }
 0x124   : > { %vm3437_vm5 = vmand %vm3381_vm12, %vm4058_vm4  ;;  %v1758_v56 = vpop.eup %1757  ;;  %v3477_v41 = vmul.f32 0.6931472, %v1756_v28  ;;  %1779 = vlog2.f32 %v3276_v50 }
 0x125   : > { %vm4063_vm13 = vmmov %vm4058_vm4  ;;  %1260 = vst [vmem:[%s476_s17] sm:$0xff] %v1248_v24  ;;  %v3480_v57 = vpop.eup %1759 }
 0x126   : > { %vm3456_vm12 = vmand %vm3411_vm0, %vm4063_vm13 }
 0x127   : > { %1921 = shalt.err (!%p1918_p9)
}
 0x128   : > { %s1922_s4 = scalar_lea.hbm %s3448_s27, 128  ;;  %s1926_s26 = scalar_lea.hbm %s4062_s12, 256 }
 0x129   : > { %p1923_p10 = scmp.ne.s32.totalorder %s3448_s27, %s1922_s4  ;;  %p1927_p1 = scmp.lt.s32.totalorder %s3448_s27, %s4062_s12 }
 0x12a   : > { %p1928_p2 = scmp.lt.s32.totalorder %s1926_s26, %s1922_s4 }
 0x12b   : > { %p1924_p13 = pnand %p1923_p10, %p2233_p0 }
 0x12c   : > { %p1929_p4 = por %p1928_p2, %p1927_p1 }
 0x12d   : > { %p1925_p5 = pneg %p1924_p13 }
 0x12f   : > { %p1930_p6 = pnand %p1929_p4, %p1925_p5 }
 0x131   : > { %1933 = shalt.err (!%p1930_p6)
}
 0x132   : > { %1628 = dma.vmem_to_hbm [thread:$0]  (%p2233_p0), %s3450_s1, 128, %s3448_s27, %s3489_s8   ;;  %v1052_v46 = vmul.f32 %v1036_v23, %v1036_v23  ;;  %v1053_v48 = vmul.f32 %v1037_v26, %v1037_v26  ;;  %v1054_v24 = vmul.f32 %v1038_v37, %v1038_v37  ;;  %v3521_v28 = vmul.f32 0.6931472, %v1758_v56 }
 0x133   : > { %s1934_s7 = scalar_lea.vmem %s3472_s30, 128  ;;  %s2077_s2 = smov [#allocation20]  }
 0x134   : > { %p1935_p3 = scmp.ne.s32.totalorder %s3472_s30, %s1934_s7  ;;  %s1938_s17 = sshll.u32 %s2077_s2, 4  ;;  %s1939_s17 = int_to_ptr.vmem [resolvable:$false] %s1938_s17 }
 0x135   : > { %s1940_s1 = scalar_lea.vmem %s1939_s17, 256  ;;  %p1941_p11 = scmp.lt.s32.totalorder %s3472_s30, %s1939_s17 }
 0x136   : > { %p1936_p8 = pnand %p1935_p3, %p2233_p0  ;;  %p1942_p7 = scmp.lt.s32.totalorder %s1940_s1, %s1934_s7 }
 0x138   : > { %p1937_p12 = pneg %p1936_p8  ;;  %p1943_p9 = por %p1942_p7, %p1941_p11 }
 0x13a   : > { %p1944_p10 = pnand %p1943_p9, %p1937_p12 }
 0x13c   : > { %1947 = shalt.err (!%p1944_p10)
}
 0x13d   : > { %s1948_s21 = scalar_lea.hbm %s3470_s18, 128  ;;  %s1952_s27 = scalar_lea.hbm %s4067_s6, 256 }
 0x13e   : > { %p1949_p13 = scmp.ne.s32.totalorder %s3470_s18, %s1948_s21  ;;  %p1953_p2 = scmp.lt.s32.totalorder %s3470_s18, %s4067_s6 }
 0x13f   : > { %p1954_p4 = scmp.lt.s32.totalorder %s1952_s27, %s1948_s21 }
 0x140   : > { %p1950_p5 = pnand %p1949_p13, %p2233_p0 }
 0x141   : > { %p1955_p6 = por %p1954_p4, %p1953_p2 }
 0x142   : > { %p1951_p1 = pneg %p1950_p5 }
 0x144   : > { %p1956_p3 = pnand %p1955_p6, %p1951_p1 }
 0x146   : > { %1959 = shalt.err (!%p1956_p3)
}
 0x147   : > { %1629 = dma.vmem_to_hbm [thread:$0]  (%p2233_p0), %s3472_s30, 128, %s3470_s18, %s3489_s8   ;;  %v1762_v4 = vpop.eup %1761  ;;  %v1055_v30 = vmul.f32 %v1039_v54, %v1039_v54  ;;  %v1065_v58 = vmul.f32 %v3461_v29, %v3207_v11  ;;  %1781 = vlog2.f32 %v3308_v2  ;;  %v1113_v23 = vsub.f32 0.0, %v3463_v20  ;;  %vm3562_vm0 = vmor %vm4052_vm2, %vm3064_vm15 }
 0x148   : > { %v1056_v26 = vmul.f32 %v1040_v63, %v1040_v63  ;;  %v1066_v37 = vmul.f32 %v3475_v31, %v3212_v25  ;;  %v1088_v56 = vmul.f32 0.6931472, %v3480_v57  ;;  %v1114_v9 = vsub.f32 0.0, %v3477_v41  ;;  %v1764_v5 = vpop.eup %1763  ;;  %vm4076_vm15 = vmmov %vm4052_vm2  ;;  %s469_s30 = scalar_lea.vmem [#allocation17], %s2897_s13  ;;  %s4144_s8 = sld [smem:[#allocation56_spill]] }
 0x149   : > { %v4072_v40 = vsub.f32 1.0, %v3230_v44  ;;  %v4073_v54 = vsub.f32 1.0, %v3246_v15  ;;  %v4074_v63 = vsub.f32 1.0, %v3276_v50  ;;  %v4075_v22 = vsub.f32 1.0, %v3308_v2  ;;  %v1766_v29 = vpop.eup %1765  ;;  %vm3588_vm14 = vmor %vm4076_vm15, %vm3073_vm1  ;;  %s1288_s15 = sshll.u32 %s469_s30, 4  ;;  %s1264_s24 = scalar_lea.sflag [#allocation7], %s4001_s5  ;;  %s1289_s15 = int_to_ptr.vmem [resolvable:$true] %s1288_s15 }
 0x14a   : > { %v1067_v15 = vmul.f32 %v3484_v61, %v3217_v7  ;;  %v1090_v50 = vmul.f32 0.6931472, %v1762_v4  ;;  %1783 = vlog2.f32 %v3343_v36  ;;  %v1115_v2 = vsub.f32 0.0, %v3521_v28  ;;  %vm4079_vm4 = vmmov %vm4052_vm2  ;;  %v1768_v39 = vpop.eup %1767  ;;  %s1960_s11 = scalar_lea.vmem %s1289_s15, 128  ;;  %s2078_s28 = smov [#allocation17]  }
 0x14b   : > { %v1057_v20 = vmul.f32 %v4072_v40, %v4072_v40  ;;  %v3572_v25 = vmul.f32 %v4073_v54, %v4073_v54  ;;  %v3577_v57 = vmul.f32 %v4074_v63, %v4074_v63  ;;  %v3582_v31 = vmul.f32 %v4075_v22, %v4075_v22  ;;  %vm3600_vm13 = vmor %vm4079_vm4, %vm3083_vm6  ;;  %p1961_p8 = scmp.ne.s32.totalorder %s1289_s15, %s1960_s11  ;;  %s1964_s4 = sshll.u32 %s2078_s28, 4  ;;  %s1965_s4 = int_to_ptr.vmem [resolvable:$false] %s1964_s4 }
 0x14c   : > { %v1062_v41 = vmul.f32 %v1046_v51, %v1046_v51  ;;  %v1063_v7 = vmul.f32 %v1047_v45, %v1047_v45  ;;  %v4082_v61 = vsub.f32 1.0, %v3390_v19  ;;  %v1129_v4 = vmul.f32 %v1113_v23, %v1065_v58  ;;  %v1770_v45 = vpop.eup %1769  ;;  %s1966_s19 = scalar_lea.vmem %s1965_s4, 256  ;;  %p1967_p7 = scmp.lt.s32.totalorder %s1289_s15, %s1965_s4 }
 0x14d   : > { %vm4083_vm1 = vcmp.lt.s32.totalorder %v2875_v43, 576  ;;  %v1068_v33 = vmul.f32 %v1052_v46, %v3235_v60  ;;  %v1092_v51 = vmul.f32 0.6931472, %v1764_v5  ;;  %v1116_v47 = vsub.f32 0.0, %v1088_v56  ;;  %v1772_v60 = vpop.eup %1771  ;;  %p1962_p12 = pnand %p1961_p8, %p2233_p0  ;;  %p1968_p9 = scmp.lt.s32.totalorder %s1966_s19, %s1960_s11 }
 0x14e   : > { %v1064_v28 = vmul.f32 %v4082_v61, %v4082_v61  ;;  %vm3617_vm6 = vmand %vm3562_vm0, %vm4083_vm1  ;;  %v1130_v54 = vmul.f32 %v1114_v9, %v1066_v37  ;;  %v1069_v58 = vmul.f32 %v1053_v48, %v3240_v55  ;;  %v1070_v23 = vmul.f32 %v1054_v24, %v3251_v32  ;;  %v1774_v32 = vpop.eup %1773  ;;  %s1286_s20 = scalar_lea.hbm %s4144_s8, %s3404_s25 }
 0x14f   : > { %vm4086_vm2 = vmmov %vm4083_vm1  ;;  %v1071_v11 = vmul.f32 %v1055_v30, %v3265_v35  ;;  %v1094_v63 = vmul.f32 0.6931472, %v1766_v29  ;;  %v1072_v46 = vmul.f32 %v1056_v26, %v3270_v1  ;;  %v3643_v37 = vmul.f32 %v1057_v20, %v3281_v13  ;;  %v1776_v13 = vpop.eup %1775  ;;  %p1963_p11 = pneg %p1962_p12  ;;  %p1969_p10 = por %p1968_p9, %p1967_p7 }
 0x150   : > { %vm3626_vm15 = vmand %vm3588_vm14, %vm4086_vm2  ;;  %v1117_v55 = vsub.f32 0.0, %v1090_v50  ;;  %v1131_v48 = vmul.f32 %v1115_v2, %v1067_v15  ;;  %v1078_v35 = vmul.f32 %v1062_v41, %v3375_v59  ;;  %v1079_v24 = vmul.f32 %v1063_v7, %v3395_v12  ;;  %v1778_v12 = vpop.eup %1777 }
 0x151   : > { %vm4089_vm0 = vmmov %vm4079_vm4  ;;  %v1096_v30 = vmul.f32 0.6931472, %v1768_v39  ;;  %v1145_v1 = vsel %vm3617_vm6, %v1129_v4, 0.0  ;;  %v1108_v56 = vmul.f32 0.6931472, %v1774_v32  ;;  %v1118_v9 = vsub.f32 0.0, %v1092_v51  ;;  %v1780_v50 = vpop.eup %1779  ;;  %p1970_p13 = pnand %p1969_p10, %p1963_p11 }
 0x152   : > { %vm3637_vm4 = vmor %vm4089_vm0, %vm3092_vm9  ;;  %v1132_v20 = vmul.f32 %v1116_v47, %v1068_v33  ;;  %v1146_v59 = vsel %vm3626_vm15, %v1130_v54, 0.0  ;;  %v1080_v10 = vmul.f32 %v1064_v28, %v3400_v38  ;;  %v1098_v29 = vmul.f32 0.6931472, %v1770_v45 }
 0x153   : > { %vm4092_vm14 = vmmov %vm4083_vm1  ;;  %v1110_v44 = vmul.f32 0.6931472, %v1776_v13  ;;  %v1119_v15 = vsub.f32 0.0, %v1094_v63  ;;  %v1112_v0 = vmul.f32 0.6931472, %v1778_v12  ;;  %v1126_v41 = vsub.f32 0.0, %v1108_v56 }
 0x154   : > { %vm3649_vm1 = vmand %vm3600_vm13, %vm4092_vm14  ;;  %v1133_v7 = vmul.f32 %v1117_v55, %v1069_v58  ;;  %v1100_v27 = vmul.f32 0.6931472, %v1772_v60  ;;  %v1120_v28 = vsub.f32 0.0, %v1096_v30  ;;  %v1162_v39 = vadd.f32 %v1146_v59, %v1145_v1  ;;  %v1782_v40 = vpop.eup %1781 }
 0x155   : > { %vm4095_vm9 = vmmov %vm4089_vm0  ;;  %v1147_v61 = vsel %vm3649_vm1, %v1131_v48, 0.0  ;;  %v1127_v4 = vsub.f32 0.0, %v1110_v44  ;;  %v1128_v51 = vsub.f32 0.0, %v1112_v0  ;;  %v1134_v47 = vmul.f32 %v1118_v9, %v1070_v23 }
 0x156   : > { %vm3661_vm2 = vmor %vm4095_vm9, %vm3102_vm8  ;;  %v3702_v54 = vmul.f32 %v1126_v41, %v1078_v35  ;;  %v1102_v42 = vmul.f32 0.6931472, %v1780_v50  ;;  %v1121_v58 = vsub.f32 0.0, %v1098_v29  ;;  %v1163_v60 = vadd.f32 %v1162_v39, %v1147_v61 }
 0x157   : > { %vm4098_vm13 = vmmov %vm4092_vm14  ;;  %v3714_v63 = vmul.f32 %v1127_v4, %v1079_v24  ;;  %v1135_v5 = vmul.f32 %v1119_v15, %v1071_v11  ;;  %v1144_v55 = vmul.f32 %v1128_v51, %v1080_v10  ;;  %v1784_v52 = vpop.eup %1783  ;;  %v1074_v11 = vmul.f32 %v3572_v25, %v3287_v21 }
 0x158   : > { %vm3671_vm6 = vmand %vm3637_vm4, %vm4098_vm13  ;;  %v1158_v32 = vsel %vm3424_vm10, %v3702_v54, 0.0  ;;  %v1104_v35 = vmul.f32 0.6931472, %v1782_v40  ;;  %vm4120_vm10 = vnez %v4025_v49  ;;  %v1122_v1 = vsub.f32 0.0, %v1100_v27 }
 0x159   : > { %vm4101_vm8 = vmmov %vm4089_vm0  ;;  %v1148_v45 = vsel %vm3671_vm6, %v1132_v20, 0.0  ;;  %v1159_v24 = vsel %vm3437_vm5, %v3714_v63, 0.0  ;;  %v1136_v13 = vmul.f32 %v1120_v28, %v1072_v46  ;;  %v1160_v21 = vsel %vm3456_vm12, %v1144_v55, 0.0 }
 0x15a   : > { %vm3680_vm15 = vmor %vm4101_vm8, %vm3110_vm11  ;;  %v1164_v30 = vadd.f32 %v1163_v60, %v1148_v45  ;;  %v4127_v3 = vmov 0.75   ;;  %v4129_v46 = vsub.f32 1.0, %v3343_v36  ;;  %v1075_v62 = vmul.f32 %v3577_v57, %v3292_v6 }
 0x15b   : > { %vm4104_vm0 = vmmov %vm4098_vm13  ;;  %vm4130_vm12 = vnez %v4028_v8  ;;  %v1106_v20 = vmul.f32 0.6931472, %v1784_v52  ;;  %v1123_v59 = vsub.f32 0.0, %v1102_v42  ;;  %v1137_v12 = vmul.f32 %v1121_v58, %v3643_v37 }
 0x15c   : > { %vm3690_vm4 = vmand %vm3661_vm2, %vm4104_vm0  ;;  %v1061_v56 = vmul.f32 %v4129_v46, %v4129_v46  ;;  %v1029_v8 = vsel %vm3299_vm7, 0.25, %v4127_v3  ;;  %v1124_v37 = vsub.f32 0.0, %v1104_v35  ;;  %v1138_v10 = vmul.f32 %v1122_v1, %v1074_v11 }
 0x15d   : > { %vm4107_vm11 = vmmov %vm4101_vm8  ;;  %v1149_v48 = vsel %vm3690_vm4, %v1133_v7, 0.0  ;;  %v1125_v50 = vsub.f32 0.0, %v1106_v20 }
 0x15e   : > { %vm3698_vm14 = vmor %vm4107_vm11, %vm4029_vm3  ;;  %vm4113_vm3 = vnez %v4023_v17  ;;  %vm4128_vm11 = vnez %v4034_v18  ;;  %v1165_v9 = vadd.f32 %v1164_v30, %v1149_v48 }
 0x15f   : > { %vm4110_vm1 = vmmov %vm4104_vm0  ;;  %v1028_v25 = vsel %vm4128_vm11, 0.25, %v4127_v3 }
 0x160   : > { %vm3710_vm9 = vmand %vm3680_vm15, %vm4110_vm1  ;;  %v1076_v57 = vmul.f32 %v3582_v31, %v1028_v25  ;;  %v1139_v31 = vmul.f32 %v1123_v59, %v1075_v62 }
 0x161   : > { %vm4114_vm2 = vmmov %vm4101_vm8  ;;  %v1150_v26 = vsel %vm3710_vm9, %v1134_v47, 0.0 }
 0x162   : > { %vm3720_vm13 = vmor %vm4114_vm2, %vm4113_vm3  ;;  %v1166_v6 = vadd.f32 %v1165_v9, %v1150_v26  ;;  %v1140_v18 = vmul.f32 %v1124_v37, %v1076_v57 }
 0x163   : > { %vm4117_vm6 = vmmov %vm4104_vm0 }
 0x164   : > { %vm3733_vm8 = vmand %vm3698_vm14, %vm4117_vm6 }
 0x165   : > { %vm4121_vm15 = vmmov %vm4114_vm2  ;;  %v1151_v22 = vsel %vm3733_vm8, %v1135_v5, 0.0 }
 0x166   : > { %vm3746_vm0 = vmor %vm4121_vm15, %vm4120_vm10  ;;  %v1167_v15 = vadd.f32 %v1166_v6, %v1151_v22 }
 0x167   : > { %vm4124_vm4 = vmmov %vm4110_vm1 }
 0x168   : > { %vm3758_vm5 = vmand %vm3720_vm13, %vm4124_vm4 }
 0x169   : > { %vm4131_vm14 = vmmov %vm4114_vm2  ;;  %vm4135_vm2 = vnez %v4032_v14  ;;  %v1152_v29 = vsel %vm3758_vm5, %v1136_v13, 0.0  ;;  %v1077_v14 = vmul.f32 %v1061_v56, %v1029_v8 }
 0x16a   : > { %vm912_vm1 = vmor %vm4131_vm14, %vm4130_vm12  ;;  %v1168_v0 = vadd.f32 %v1167_v15, %v1152_v29 }
 0x16b   : > { %vm4132_vm9 = vmmov %vm4124_vm4  ;;  %v1141_v61 = vmul.f32 %v1125_v50, %v1077_v14 }
 0x16c   : > { %vm3781_vm3 = vmand %vm3746_vm0, %vm4132_vm9 }
 0x16d   : > { %vm4136_vm13 = vmmov %vm4131_vm14  ;;  %v1153_v2 = vsel %vm3781_vm3, %v1137_v12, 0.0 }
 0x16e   : > { %vm913_vm6 = vmor %vm4136_vm13, %vm4135_vm2  ;;  %v1169_v7 = vadd.f32 %v1168_v0, %v1153_v2 }
 0x16f   : > { %vm4137_vm8 = vmmov %vm4124_vm4 }
 0x170   : > { %vm3797_vm10 = vmand %vm912_vm1, %vm4137_vm8 }
 0x171   : > { %vm4140_vm15 = vmmov %vm4136_vm13  ;;  %v1154_v41 = vsel %vm3797_vm10, %v1138_v10, 0.0 }
 0x172   : > { %vm914_vm0 = vmor %vm4140_vm15, %vm4128_vm11  ;;  %v1170_v34 = vadd.f32 %v1169_v7, %v1154_v41 }
 0x173   : > { %vm931_vm5 = vmand %vm913_vm6, %vm4124_vm4 }
 0x174   : > { %vm4141_vm12 = vmmov %vm4136_vm13  ;;  %v1155_v38 = vsel %vm931_vm5, %v1139_v31, 0.0 }
 0x175   : > { %vm915_vm14 = vmor %vm4141_vm12, %vm3299_vm7  ;;  %v1171_v16 = vadd.f32 %v1170_v34, %v1155_v38 }
 0x176   : > { %vm4142_vm11 = vmmov %vm4124_vm4 }
 0x177   : > { %vm932_vm1 = vmand %vm914_vm0, %vm4142_vm11 }
 0x178   : > { %vm4143_vm9 = vmmov %vm4124_vm4  ;;  %v1156_v27 = vsel %vm932_vm1, %v1140_v18, 0.0 }
 0x179   : > { %vm933_vm3 = vmand %vm915_vm14, %vm4143_vm9  ;;  %v1172_v4 = vadd.f32 %v1171_v16, %v1156_v27 }
 0x17a   : > { %v1157_v28 = vsel %vm933_vm3, %v1141_v61, 0.0 }
 0x17b   : > { %v1173_v39 = vadd.f32 %v1172_v4, %v1157_v28 }
 0x17d   : > { %v1174_v40 = vadd.f32 %v1173_v39, %v1158_v32 }
 0x17f   : > { %v1175_v33 = vadd.f32 %v1174_v40, %v1159_v24 }
 0x181   : > { %v1176_v51 = vadd.f32 %v1175_v33, %v1160_v21 }
 0x183   : > { %1258 = vst [vmem:[%s469_s30] sm:$0xff] %v1176_v51 }
 0x184   : > { %1973 = shalt.err (!%p1970_p13)
}
 0x185   : > { %s1974_s13 = scalar_lea.hbm %s1286_s20, 128  ;;  %s1978_s0 = scalar_lea.hbm %s4144_s8, 256 }
 0x186   : > { %p1975_p5 = scmp.ne.s32.totalorder %s1286_s20, %s1974_s13  ;;  %p1979_p4 = scmp.lt.s32.totalorder %s1286_s20, %s4144_s8 }
 0x187   : > { %p1980_p6 = scmp.lt.s32.totalorder %s1978_s0, %s1974_s13 }
 0x188   : > { %p1976_p1 = pnand %p1975_p5, %p2233_p0 }
 0x189   : > { %p1981_p3 = por %p1980_p6, %p1979_p4 }
 0x18a   : > { %p1977_p2 = pneg %p1976_p1 }
 0x18c   : > { %p1982_p8 = pnand %p1981_p3, %p1977_p2 }
 0x18e   : > { %1985 = shalt.err (!%p1982_p8)
}
 0x18f   : > { %1627 = dma.vmem_to_hbm [thread:$0]  (%p2233_p0), %s1289_s15, 128, %s1286_s20, %s1264_s24  }
 0x190 PF: > { %s4145_s10 = sld [smem:[#allocation29_spill]] }
 0x191   : > { %s4146_s7 = sld [smem:[#allocation35_spill]] }
 0x192   : > { %s4147_s2 = sld [smem:[#allocation33_spill]] }
 0x196   : > { %s1328_s17 = sand.u32 1, %s4145_s10  }
 0x197   : > { %p4148_p12 = scmp.ne.s32.totalorder %s4146_s7, 0  ;;  %s1329_s1 = scalar_lea.sflag [#allocation7], %s1328_s17 }
 0x198   : > { %p4149_p11 = scmp.ge.s32.totalorder %s4147_s2, 2 }
 0x19a   : > { %p1654_p7 = pnand %p4149_p11, %p4148_p12 }
 0x19c   : > { %p1655_p9 = pneg %p1654_p7 }
 0x19e   : > { %2035 = dma.done.wait (%p1655_p9), %s1329_s1, 128  }
 0x19f   : > { %2037 = vsyncadd (%p1655_p9), %s1329_s1, 4294967168  ;;  %s4150_s21 = sadd.s32 4294967294, %s4147_s2  }
 0x1a0   : > { %s1337_s3 = sand.u32 1, %s4150_s21  }
 0x1a1   : > { %s1338_s29 = scalar_lea.sflag [#allocation19], %s1337_s3 }
 0x1a2   : > { %2039 = dma.done.wait (%p1655_p9), %s1338_s29, 256  }
 0x1a3   : > { %2041 = vsyncadd (%p1655_p9), %s1338_s29, 4294967040  ;;  %s34_s10 = sadd.s32 1, %s4147_s2   ;;  %s4151_s27 = sld [smem:[#allocation30_spill]] }
 0x1a4   : > { %p31_p0 = scmp.ge.s32.totalorder %s34_s10, 4   ;;  %s4152_s28 = sld [smem:[#allocation31_spill]] }
 0x1a5   : > { %s4153_s29 = sld [smem:[#allocation38_spill]] }
 0x1a6   : > { %s4154_s30 = sld [smem:[#allocation32_spill]]  ;;  %33 = sbr.rel (!%p31_p0) target bundleno = 23 (0x17), region = 161 }
 0x1a7   : > { %s4155_s9 = sld [smem:[#allocation36_spill]] }
 0x1ab   :  { %1352 = vsyncpa [#allocation6], 1 }
 0x1ac   :  { %1354 = vsyncpa [#allocation6 + $0x1], 1 }
 0x1ad   :  { %1355 = vsyncpa [#allocation15], 1 }
 0x1ae   :  { %1357 = vsyncpa [#allocation15 + $0x1], 1 }
 0x1af   :  { %1358 = vsyncpa [#allocation7], 1 }
 0x1b0   :  { %1360 = vsyncpa [#allocation7 + $0x1], 1 }
 0x1b1   :  { %1361 = vsyncpa [#allocation19], 1 }
 0x1b2   :  { %1363 = vsyncpa [#allocation19 + $0x1], 1 }
 0x1b3   :  { %1364 = vsyncpa [#allocation8], 1 }
 0x1b4   :  { %1366 = vsyncpa [#allocation8 + $0x1], 1 }
 0x1b5   :  { %1367 = vsyncpa [#allocation9], 1 }
 0x1b6   :  { %1369 = vsyncpa [#allocation9 + $0x1], 1 }
 0x1b7   :  { %1370 = vsyncpa [#allocation12], 1 }

</bundles_post_ra>
